<compile_context>
chip_gen: v6e
topology: v6e:2x2x1
jax: 0.10.0
libtpu: 0.0.40
codegen_flags: <defaults>
</compile_context>

<pallas_src>
import functools

import jax
import jax.numpy as jnp
from jax import lax
from jax.experimental import pallas as pl
from jax.experimental.pallas import tpu as pltpu

_VMEM_LIMIT_BYTES = 48 * 1024 * 1024


# ----------------------------------------------------------------------------
# Complex helpers (traced inside kernels).
# ----------------------------------------------------------------------------
def _cplx_matmul_right(xr, xi, mr, mi, ms):
    """Batched complex (..., K) @ (K, N) via the Gauss 3-multiplication trick."""
    shape = xr.shape
    k = shape[-1]
    n = mr.shape[-1]
    ar = xr.reshape(-1, k)
    ai = xi.reshape(-1, k)
    dot = functools.partial(jnp.dot, preferred_element_type=jnp.float32,
                            precision=lax.Precision.HIGHEST)
    t1 = dot(ar, mr)
    t2 = dot(ai, mi)
    t3 = dot(ar + ai, ms)
    yr = t1 - t2
    yi = t3 - t1 - t2
    out_shape = shape[:-1] + (n,)
    return yr.reshape(out_shape), yi.reshape(out_shape)


def _cplx_dft2(xr, xi, htr, hti, hts, wtr, wti, wts):
    """Batched centered 2-D (i)DFT:  Y_b = M_H @ X_b @ M_W^T  (complex).

    Both axes are applied as *right*-multiplications (the H axis on transposed
    planes), so every matmul has free dimension B*H or B*W — one big MXU
    matmul per term instead of B tiny ones.
    """
    zr, zi = _cplx_matmul_right(xr, xi, wtr, wti, wts)          # along W
    ztr = jnp.swapaxes(zr, -1, -2)                              # (B, W, H)
    zti = jnp.swapaxes(zi, -1, -2)
    ytr, yti = _cplx_matmul_right(ztr, zti, htr, hti, hts)      # along H
    return jnp.swapaxes(ytr, -1, -2), jnp.swapaxes(yti, -1, -2)


def centered_dft_mats(H, W):
    """Centered orthonormal DFT / IDFT matrices (fftshift . fft . ifftshift).

    All matrices are returned pre-transposed so kernels only ever do
    right-multiplications X @ M.
    Returns (FHt_r, FHt_i, FWt_r, FWt_i, IFHt_r, IFHt_i, IFWt_r, IFWt_i).
    """
    def mats(n):
        eye = jnp.eye(n, dtype=jnp.complex64)
        sh = jnp.fft.ifftshift(eye, axes=0)
        F = jnp.fft.fftshift(jnp.fft.fft(sh, axis=0, norm="ortho"), axes=0)
        Fi = jnp.fft.fftshift(jnp.fft.ifft(sh, axis=0, norm="ortho"), axes=0)
        return F, Fi

    FH, IFH = mats(H)
    FW, IFW = mats(W)
    r = lambda z: z.real.astype(jnp.float32)
    im = lambda z: z.imag.astype(jnp.float32)
    return (r(FH.T), im(FH.T), r(FW.T), im(FW.T),
            r(IFH.T), im(IFH.T), r(IFW.T), im(IFW.T))


# ----------------------------------------------------------------------------
# SENSE adjoint kernel:  zf = ifft2c(mask * (mask * kspace)), batched over B.
# (the module does `kspace *= mask` before calling adjoint -> mask twice)
# ----------------------------------------------------------------------------
def _adjoint_kernel(k_ref, m_ref, ihtr, ihti, iwtr, iwti, o_ref):
    k = k_ref[...]                       # (B, 2, H, W)
    m = m_ref[...]                       # (B, H, W)
    m2 = m * m                           # NOTE: assumes binary mask
    kr = k[:, 0] * m2
    ki = k[:, 1] * m2
    IHTR, IHTI = ihtr[...], ihti[...]
    IWTR, IWTI = iwtr[...], iwti[...]
    xr, xi = _cplx_dft2(kr, ki, IHTR, IHTI, IHTR + IHTI,
                        IWTR, IWTI, IWTR + IWTI)
    o_ref[:, 0] = xr
    o_ref[:, 1] = xi


def sense_adjoint(kspace_c, mask, mats):
    """kspace_c: (B,2,H,W); mask: (B,H,W) -> zero-filled image (B,2,H,W)."""
    B, _, H, W = kspace_c.shape
    _, _, _, _, ihtr, ihti, iwtr, iwti = mats
    mat_h = pl.BlockSpec((H, H), lambda i: (0, 0))
    mat_w = pl.BlockSpec((W, W), lambda i: (0, 0))
    img_spec = pl.BlockSpec((B, 2, H, W), lambda i: (0, 0, 0, 0))
    return pl.pallas_call(
        _adjoint_kernel,
        out_shape=jax.ShapeDtypeStruct((B, 2, H, W), jnp.float32),
        grid=(1,),                              # whole batch in one invocation
        in_specs=[
            img_spec,
            pl.BlockSpec((B, H, W), lambda i: (0, 0, 0)),
            mat_h, mat_h, mat_w, mat_w,
        ],
        out_specs=img_spec,
        compiler_params=pltpu.CompilerParams(
            dimension_semantics=("arbitrary",),
            vmem_limit_bytes=_VMEM_LIMIT_BYTES),
    )(kspace_c, mask, ihtr, ihti, iwtr, iwti)


# ----------------------------------------------------------------------------
# CG kernel: solves (A^H A + lam I) x = (zf + lam * denoised), x0 = rhs,
# with A^H A x = ifft2c(mask^2 * fft2c(x)).  Whole CG loop runs in-kernel,
# batched over B, fully unrolled.
# ----------------------------------------------------------------------------
def _make_cg_kernel(lam, n_iter):
    def kernel(zf_ref, den_ref, m_ref,
               fhtr, fhti, fwtr, fwti, ihtr, ihti, iwtr, iwti, o_ref):
        zf = zf_ref[...]                     # (B, 2, H, W)
        den = den_ref[...]
        m = m_ref[...]                       # (B, H, W)
        m2 = m * m                           # NOTE: assumes binary mask

        FHTR, FHTI = fhtr[...], fhti[...]
        FWTR, FWTI = fwtr[...], fwti[...]
        IHTR, IHTI = ihtr[...], ihti[...]
        IWTR, IWTI = iwtr[...], iwti[...]
        FHTS, FWTS = FHTR + FHTI, FWTR + FWTI    # Gauss-trick sums (hoisted)
        IHTS, IWTS = IHTR + IHTI, IWTR + IWTI

        def aop(xr, xi):
            kr, ki = _cplx_dft2(xr, xi, FHTR, FHTI, FHTS, FWTR, FWTI, FWTS)
            kr = kr * m2
            ki = ki * m2
            nr, ni = _cplx_dft2(kr, ki, IHTR, IHTI, IHTS, IWTR, IWTI, IWTS)
            return nr + lam * xr, ni + lam * xi

        def bdot(ar, ai, br, bi):            # per-batch Re<a, b>, shape (B,1,1)
            return jnp.sum(ar * br + ai * bi, axis=(1, 2), keepdims=True)

        rhs_r = zf[:, 0] + lam * den[:, 0]
        rhs_i = zf[:, 1] + lam * den[:, 1]

        xr, xi = rhs_r, rhs_i                # x0 = rhs
        axr, axi = aop(xr, xi)
        rr, ri = rhs_r - axr, rhs_i - axi
        pr, pi = rr, ri
        rs0 = bdot(rr, ri, rr, ri)

        def body(_, carry):
            xr, xi, rr, ri, pr, pi, rsold = carry
            apr, api = aop(pr, pi)
            pap = bdot(pr, pi, apr, api)
            alpha = rsold / pap
            xr = xr + alpha * pr
            xi = xi + alpha * pi
            rr = rr - alpha * apr
            ri = ri - alpha * api
            rsnew = bdot(rr, ri, rr, ri)
            beta = rsnew / rsold
            pr = rr + beta * pr
            pi = ri + beta * pi
            return xr, xi, rr, ri, pr, pi, rsnew

        # TODO(synk): reference ConjGrad has a data-dependent eps early-exit;
        # fixed, fully unrolled num_cg_steps iterations are run here.
        xr, xi, *_ = lax.fori_loop(0, n_iter, body,
                                   (xr, xi, rr, ri, pr, pi, rs0),
                                   unroll=True)
        o_ref[:, 0] = xr
        o_ref[:, 1] = xi
    return kernel


def sense_cg_solve(zf, den, mask, mats, lam, n_iter):
    """zf, den: (B,2,H,W); mask: (B,H,W) -> CG solution (B,2,H,W)."""
    B, _, H, W = zf.shape
    fhtr, fhti, fwtr, fwti, ihtr, ihti, iwtr, iwti = mats
    img_spec = pl.BlockSpec((B, 2, H, W), lambda i: (0, 0, 0, 0))
    mat_h = pl.BlockSpec((H, H), lambda i: (0, 0))
    mat_w = pl.BlockSpec((W, W), lambda i: (0, 0))
    return pl.pallas_call(
        _make_cg_kernel(float(lam), int(n_iter)),
        out_shape=jax.ShapeDtypeStruct((B, 2, H, W), jnp.float32),
        grid=(1,),
        in_specs=[img_spec, img_spec,
                  pl.BlockSpec((B, H, W), lambda i: (0, 0, 0)),
                  mat_h, mat_h, mat_w, mat_w,
                  mat_h, mat_h, mat_w, mat_w],
        out_specs=img_spec,
        compiler_params=pltpu.CompilerParams(
            dimension_semantics=("arbitrary",),
            vmem_limit_bytes=_VMEM_LIMIT_BYTES),
    )(zf, den, mask, fhtr, fhti, fwtr, fwti, ihtr, ihti, iwtr, iwti)


# ----------------------------------------------------------------------------
# Fused UNet double-conv block kernel: conv3x3+ReLU -> conv3x3+ReLU
# (-> optional fused 1x1 conv, no ReLU).  No HBM im2col: zero-padding and the
# intermediate activation live in VMEM scratch; bf16 MXU matmuls, f32 accum.
# ----------------------------------------------------------------------------
def _make_fused_block_kernel(B, H, W, Cin, C1, C2, Cout, fuse_out):
    def kernel(*refs):
        if fuse_out:
            (x_ref, w1_ref, b1_ref, w2_ref, b2_ref,
             w3_ref, b3_ref, o_ref, xp_ref, hp_ref) = refs
        else:
            x_ref, w1_ref, b1_ref, w2_ref, b2_ref, o_ref, xp_ref, hp_ref = refs

        n = B * H * W

        # conv1: zero-pad input into VMEM scratch, accumulate 9 shifted matmuls.
        xp_ref[...] = jnp.zeros_like(xp_ref)
        xp_ref[:, 1:H + 1, 1:W + 1, :] = x_ref[...].astype(jnp.bfloat16)
        acc1 = jnp.zeros((n, C1), jnp.float32)
        for dh in range(3):
            for dw in range(3):
                patch = xp_ref[:, dh:dh + H, dw:dw + W, :].reshape(n, Cin)
                acc1 = acc1 + jnp.dot(patch, w1_ref[dh * 3 + dw],
                                      preferred_element_type=jnp.float32)
        h1 = jnp.maximum(acc1 + b1_ref[...], 0.0)

        # conv2: intermediate activation never round-trips HBM.
        hp_ref[...] = jnp.zeros_like(hp_ref)
        hp_ref[:, 1:H + 1, 1:W + 1, :] = (
            h1.astype(jnp.bfloat16).reshape(B, H, W, C1))
        acc2 = jnp.zeros((n, C2), jnp.float32)
        for dh in range(3):
            for dw in range(3):
                patch = hp_ref[:, dh:dh + H, dw:dw + W, :].reshape(n, C1)
                acc2 = acc2 + jnp.dot(patch, w2_ref[dh * 3 + dw],
                                      preferred_element_type=jnp.float32)
        h2 = jnp.maximum(acc2 + b2_ref[...], 0.0)

        if fuse_out:  # folded 1x1 output conv (no ReLU)
            out = jnp.dot(h2.astype(jnp.bfloat16), w3_ref[...],
                          preferred_element_type=jnp.float32) + b3_ref[...]
        else:
            out = h2
        o_ref[...] = out.reshape(B, H, W, Cout)
    return kernel


def fused_double_conv(x, conv1, conv2, out_conv=None):
    """x: (B,H,W,Cin) f32. Two 3x3 'same' convs (ReLU each) fused into one
    Pallas kernel, optionally followed by a fused 1x1 conv (no ReLU)."""
    w1, b1 = conv1
    w2, b2 = conv2
    B, H, W, Cin = x.shape
    C1 = w1.shape[-1]
    C2 = w2.shape[-1]
    w1m = w1.reshape(9, Cin, C1).astype(jnp.bfloat16)
    w2m = w2.reshape(9, C1, C2).astype(jnp.bfloat16)

    args = [x, w1m, b1, w2m, b2]
    in_specs = [
        pl.BlockSpec((B, H, W, Cin), lambda i: (0, 0, 0, 0)),
        pl.BlockSpec((9, Cin, C1), lambda i: (0, 0, 0)),
        pl.BlockSpec((1, C1), lambda i: (0, 0)),
        pl.BlockSpec((9, C1, C2), lambda i: (0, 0, 0)),
        pl.BlockSpec((1, C2), lambda i: (0, 0)),
    ]
    if out_conv is not None:
        w3, b3 = out_conv
        Cout = w3.shape[-1]
        w3m = w3.reshape(C2, Cout).astype(jnp.bfloat16)
        args += [w3m, b3]
        in_specs += [pl.BlockSpec((C2, Cout), lambda i: (0, 0)),
                     pl.BlockSpec((1, Cout), lambda i: (0, 0))]
    else:
        Cout = C2

    kernel = _make_fused_block_kernel(B, H, W, Cin, C1, C2, Cout,
                                      out_conv is not None)
    return pl.pallas_call(
        kernel,
        out_shape=jax.ShapeDtypeStruct((B, H, W, Cout), jnp.float32),
        grid=(1,),
        in_specs=in_specs,
        out_specs=pl.BlockSpec((B, H, W, Cout), lambda i: (0, 0, 0, 0)),
        scratch_shapes=[
            pltpu.VMEM((B, H + 2, W + 2, Cin), jnp.bfloat16),
            pltpu.VMEM((B, H + 2, W + 2, C1), jnp.bfloat16),
        ],
        compiler_params=pltpu.CompilerParams(
            dimension_semantics=("arbitrary",),
            vmem_limit_bytes=_VMEM_LIMIT_BYTES),
    )(*args)


# ----------------------------------------------------------------------------
# Small UNet denoiser (the per-step "resnet" in UnrolledModel).
# TODO(synk): the reference UNet(2, 2) source is not included in the prompt;
# approximated with a 2-scale UNet (3x3 conv+ReLU double-convs, 2x maxpool
# down, nearest-neighbour up, skip concat, 1x1 output conv), BatchNorm omitted.
# ----------------------------------------------------------------------------
def init_unet_params(key, cin=2, cout=2, base=8):
    ks = jax.random.split(key, 8)

    def conv_p(k, kk, ci, co):
        k1, k2 = jax.random.split(k)
        scale = 1.0 / jnp.sqrt(jnp.float32(kk * kk * ci))
        w = jax.random.normal(k1, (kk, kk, ci, co), jnp.float32) * scale
        b = jax.random.normal(k2, (1, co), jnp.float32) * 0.01
        return w, b

    return {
        "inc1": conv_p(ks[0], 3, cin, base),
        "inc2": conv_p(ks[1], 3, base, base),
        "down1": conv_p(ks[2], 3, base, 2 * base),
        "down2": conv_p(ks[3], 3, 2 * base, 2 * base),
        "up1": conv_p(ks[4], 3, 3 * base, base),
        "up2": conv_p(ks[5], 3, base, base),
        "out": conv_p(ks[6], 1, base, cout),
    }


def _maxpool2(x):  # glue
    B, H, W, C = x.shape
    return x.reshape(B, H // 2, 2, W // 2, 2, C).max(axis=(2, 4))


def _upsample2(x):  # glue (nearest)
    return jnp.repeat(jnp.repeat(x, 2, axis=1), 2, axis=2)


def unet_forward(x, p):
    h1 = fused_double_conv(x, p["inc1"], p["inc2"])                  # (B,H,W,b)
    h2 = _maxpool2(h1)
    h2 = fused_double_conv(h2, p["down1"], p["down2"])               # (B,H/2,W/2,2b)
    u = jnp.concatenate([h1, _upsample2(h2)], axis=-1)               # (B,H,W,3b)
    return fused_double_conv(u, p["up1"], p["up2"], out_conv=p["out"])  # (B,H,W,2)


# ----------------------------------------------------------------------------
# UnrolledModel.forward
# ----------------------------------------------------------------------------
def unrolled_model_forward(kspace, mask, unet_params_list, modl_lamda, num_cg_steps):
    """kspace: (B,H,W,2); mask: (B,H,W) -> image (B,H,W,2)."""
    B, H, W, _ = kspace.shape
    mats = centered_dft_mats(H, W)

    # TODO(synk): the NCHW<->NHWC transposes around the UNet remain XLA glue;
    # folding them into the conv kernel would need an in-kernel lane relayout
    # of the 2-channel axis.
    k_c = jnp.transpose(kspace, (0, 3, 1, 2))          # (B,2,H,W)
    zf = sense_adjoint(k_c, mask, mats)                # zero-filled recon
    image = zf
    for params in unet_params_list:                    # one unrolled step per UNet
        img_nhwc = jnp.transpose(image, (0, 2, 3, 1))
        den = unet_forward(img_nhwc, params)
        den_c = jnp.transpose(den, (0, 3, 1, 2))
        image = sense_cg_solve(zf, den_c, mask, mats, modl_lamda, num_cg_steps)
    return jnp.transpose(image, (0, 2, 3, 1))          # (B,H,W,2)


if __name__ == "__main__":
    B, H, W = 2, 16, 16
    num_grad_steps = 2
    num_cg_steps = 4
    modl_lamda = 0.05

    key = jax.random.PRNGKey(0)
    k1, k2, k3 = jax.random.split(key, 3)
    kspace = jax.random.normal(k1, (B, H, W, 2), dtype=jnp.float32)
    mask = (jax.random.uniform(k2, (B, H, W)) < 0.5).astype(jnp.float32)

    # share_weights = False: independent deterministic weights per grad step.
    params_list = [init_unet_params(jax.random.fold_in(k3, i))
                   for i in range(num_grad_steps)]

    out = unrolled_model_forward(kspace, mask, params_list, modl_lamda, num_cg_steps)
    out = jax.block_until_ready(out)

    assert out.shape == (B, H, W, 2), out.shape
    assert bool(jnp.all(jnp.isfinite(out)))
    print("KERNEL_OK")
</pallas_src>

<mosaic_0001>
module attributes {stable_mosaic.version = 11 : i64} {
  func.func @_adjoint_kernel(%arg0: i32, %arg1: memref<2x2x16x16xf32, #tpu.memory_space<vmem>>, %arg2: memref<2x16x16xf32, #tpu.memory_space<vmem>>, %arg3: memref<16x16xf32, #tpu.memory_space<vmem>>, %arg4: memref<16x16xf32, #tpu.memory_space<vmem>>, %arg5: memref<16x16xf32, #tpu.memory_space<vmem>>, %arg6: memref<16x16xf32, #tpu.memory_space<vmem>>, %arg7: memref<2x2x16x16xf32, #tpu.memory_space<vmem>>) attributes {dimension_semantics = [#tpu.dimension_semantics<arbitrary>], iteration_bounds = array<i64: 1>, scalar_prefetch = 0 : i64, scratch_operands = 0 : i64, tpu.core_type = #tpu.core_type<tc>, window_params = [{pipeline_mode = #tpu.pipeline_mode<synchronous>, transform_indices = @transform_0, window_bounds = array<i64: 2, 2, 16, 16>}, {pipeline_mode = #tpu.pipeline_mode<synchronous>, transform_indices = @transform_1, window_bounds = array<i64: 2, 16, 16>}, {pipeline_mode = #tpu.pipeline_mode<synchronous>, transform_indices = @transform_2, window_bounds = array<i64: 16, 16>}, {pipeline_mode = #tpu.pipeline_mode<synchronous>, transform_indices = @transform_3, window_bounds = array<i64: 16, 16>}, {pipeline_mode = #tpu.pipeline_mode<synchronous>, transform_indices = @transform_4, window_bounds = array<i64: 16, 16>}, {pipeline_mode = #tpu.pipeline_mode<synchronous>, transform_indices = @transform_5, window_bounds = array<i64: 16, 16>}, {pipeline_mode = #tpu.pipeline_mode<synchronous>, transform_indices = @transform_6, window_bounds = array<i64: 2, 2, 16, 16>}]} {
    %c0 = arith.constant 0 : index
    %c0_0 = arith.constant 0 : index
    %c0_1 = arith.constant 0 : index
    %c0_2 = arith.constant 0 : index
    %0 = vector.load %arg1[%c0, %c0_0, %c0_1, %c0_2] : memref<2x2x16x16xf32, #tpu.memory_space<vmem>>, vector<2x2x16x16xf32>
    %c0_3 = arith.constant 0 : index
    %c0_4 = arith.constant 0 : index
    %c0_5 = arith.constant 0 : index
    %1 = vector.load %arg2[%c0_3, %c0_4, %c0_5] : memref<2x16x16xf32, #tpu.memory_space<vmem>>, vector<2x16x16xf32>
    %2 = arith.mulf %1, %1 : vector<2x16x16xf32>
    %3 = vector.extract_strided_slice %0 {offsets = [0, 0, 0, 0], sizes = [2, 1, 16, 16], strides = [1, 1, 1, 1]} : vector<2x2x16x16xf32> to vector<2x1x16x16xf32>
    %4 = vector.shape_cast %3 : vector<2x1x16x16xf32> to vector<2x16x16xf32>
    %5 = arith.mulf %4, %2 : vector<2x16x16xf32>
    %6 = vector.extract_strided_slice %0 {offsets = [0, 1, 0, 0], sizes = [2, 1, 16, 16], strides = [1, 1, 1, 1]} : vector<2x2x16x16xf32> to vector<2x1x16x16xf32>
    %7 = vector.shape_cast %6 : vector<2x1x16x16xf32> to vector<2x16x16xf32>
    %8 = arith.mulf %7, %2 : vector<2x16x16xf32>
    %c0_6 = arith.constant 0 : index
    %c0_7 = arith.constant 0 : index
    %9 = vector.load %arg3[%c0_6, %c0_7] : memref<16x16xf32, #tpu.memory_space<vmem>>, vector<16x16xf32>
    %c0_8 = arith.constant 0 : index
    %c0_9 = arith.constant 0 : index
    %10 = vector.load %arg4[%c0_8, %c0_9] : memref<16x16xf32, #tpu.memory_space<vmem>>, vector<16x16xf32>
    %c0_10 = arith.constant 0 : index
    %c0_11 = arith.constant 0 : index
    %11 = vector.load %arg5[%c0_10, %c0_11] : memref<16x16xf32, #tpu.memory_space<vmem>>, vector<16x16xf32>
    %c0_12 = arith.constant 0 : index
    %c0_13 = arith.constant 0 : index
    %12 = vector.load %arg6[%c0_12, %c0_13] : memref<16x16xf32, #tpu.memory_space<vmem>>, vector<16x16xf32>
    %13 = arith.addf %9, %10 : vector<16x16xf32>
    %14 = arith.addf %11, %12 : vector<16x16xf32>
    %15 = vector.shape_cast %5 : vector<2x16x16xf32> to vector<32x16xf32>
    %16 = vector.shape_cast %8 : vector<2x16x16xf32> to vector<32x16xf32>
    %cst = arith.constant dense<0.000000e+00> : vector<32x16xf32>
    %17 = tpu.matmul %15, %11, %cst {dimension_numbers = #tpu.dot_dimension_numbers<[1], [0], [0], [1], [0, 0, 1, 1], [], []>, precision = #tpu.contract_precision<fp32>} : vector<32x16xf32>, vector<16x16xf32>, vector<32x16xf32> -> vector<32x16xf32>
    %cst_14 = arith.constant dense<0.000000e+00> : vector<32x16xf32>
    %18 = tpu.matmul %16, %12, %cst_14 {dimension_numbers = #tpu.dot_dimension_numbers<[1], [0], [0], [1], [0, 0, 1, 1], [], []>, precision = #tpu.contract_precision<fp32>} : vector<32x16xf32>, vector<16x16xf32>, vector<32x16xf32> -> vector<32x16xf32>
    %19 = arith.addf %15, %16 : vector<32x16xf32>
    %cst_15 = arith.constant dense<0.000000e+00> : vector<32x16xf32>
    %20 = tpu.matmul %19, %14, %cst_15 {dimension_numbers = #tpu.dot_dimension_numbers<[1], [0], [0], [1], [0, 0, 1, 1], [], []>, precision = #tpu.contract_precision<fp32>} : vector<32x16xf32>, vector<16x16xf32>, vector<32x16xf32> -> vector<32x16xf32>
    %21 = arith.subf %17, %18 : vector<32x16xf32>
    %22 = arith.subf %20, %17 : vector<32x16xf32>
    %23 = arith.subf %22, %18 : vector<32x16xf32>
    %24 = vector.shape_cast %21 : vector<32x16xf32> to vector<2x16x16xf32>
    %25 = vector.shape_cast %23 : vector<32x16xf32> to vector<2x16x16xf32>
    %26 = tpu.transpose %24, [0, 2, 1] : vector<2x16x16xf32> -> vector<2x16x16xf32>
    %27 = tpu.transpose %25, [0, 2, 1] : vector<2x16x16xf32> -> vector<2x16x16xf32>
    %28 = vector.shape_cast %26 : vector<2x16x16xf32> to vector<32x16xf32>
    %29 = vector.shape_cast %27 : vector<2x16x16xf32> to vector<32x16xf32>
    %cst_16 = arith.constant dense<0.000000e+00> : vector<32x16xf32>
    %30 = tpu.matmul %28, %9, %cst_16 {dimension_numbers = #tpu.dot_dimension_numbers<[1], [0], [0], [1], [0, 0, 1, 1], [], []>, precision = #tpu.contract_precision<fp32>} : vector<32x16xf32>, vector<16x16xf32>, vector<32x16xf32> -> vector<32x16xf32>
    %cst_17 = arith.constant dense<0.000000e+00> : vector<32x16xf32>
    %31 = tpu.matmul %29, %10, %cst_17 {dimension_numbers = #tpu.dot_dimension_numbers<[1], [0], [0], [1], [0, 0, 1, 1], [], []>, precision = #tpu.contract_precision<fp32>} : vector<32x16xf32>, vector<16x16xf32>, vector<32x16xf32> -> vector<32x16xf32>
    %32 = arith.addf %28, %29 : vector<32x16xf32>
    %cst_18 = arith.constant dense<0.000000e+00> : vector<32x16xf32>
    %33 = tpu.matmul %32, %13, %cst_18 {dimension_numbers = #tpu.dot_dimension_numbers<[1], [0], [0], [1], [0, 0, 1, 1], [], []>, precision = #tpu.contract_precision<fp32>} : vector<32x16xf32>, vector<16x16xf32>, vector<32x16xf32> -> vector<32x16xf32>
    %34 = arith.subf %30, %31 : vector<32x16xf32>
    %35 = arith.subf %33, %30 : vector<32x16xf32>
    %36 = arith.subf %35, %31 : vector<32x16xf32>
    %37 = vector.shape_cast %34 : vector<32x16xf32> to vector<2x16x16xf32>
    %38 = vector.shape_cast %36 : vector<32x16xf32> to vector<2x16x16xf32>
    %39 = tpu.transpose %37, [0, 2, 1] : vector<2x16x16xf32> -> vector<2x16x16xf32>
    %40 = tpu.transpose %38, [0, 2, 1] : vector<2x16x16xf32> -> vector<2x16x16xf32>
    %c0_19 = arith.constant 0 : index
    %c0_20 = arith.constant 0 : index
    %c0_21 = arith.constant 0 : index
    %c0_22 = arith.constant 0 : index
    %41 = vector.load %arg7[%c0_19, %c0_20, %c0_21, %c0_22] : memref<2x2x16x16xf32, #tpu.memory_space<vmem>>, vector<2x1x16x16xf32>
    %42 = vector.shape_cast %41 : vector<2x1x16x16xf32> to vector<2x16x16xf32>
    %43 = vector.shape_cast %39 : vector<2x16x16xf32> to vector<2x1x16x16xf32>
    tpu.vector_store %arg7[%c0_19, %c0_20, %c0_21, %c0_22], %43 {strides = array<i32>} : memref<2x2x16x16xf32, #tpu.memory_space<vmem>>, vector<2x1x16x16xf32>,
    %c0_23 = arith.constant 0 : index
    %c1 = arith.constant 1 : index
    %c0_24 = arith.constant 0 : index
    %c0_25 = arith.constant 0 : index
    %44 = vector.load %arg7[%c0_23, %c1, %c0_24, %c0_25] : memref<2x2x16x16xf32, #tpu.memory_space<vmem>>, vector<2x1x16x16xf32>
    %45 = vector.shape_cast %44 : vector<2x1x16x16xf32> to vector<2x16x16xf32>
    %46 = vector.shape_cast %40 : vector<2x16x16xf32> to vector<2x1x16x16xf32>
    tpu.vector_store %arg7[%c0_23, %c1, %c0_24, %c0_25], %46 {strides = array<i32>} : memref<2x2x16x16xf32, #tpu.memory_space<vmem>>, vector<2x1x16x16xf32>,
    return
  }
  func.func @transform_0(%arg0: i32) -> (i32, i32, i32, i32) {
    %c0_i32 = arith.constant 0 : i32
    %c0_i32_0 = arith.constant 0 : i32
    %c0_i32_1 = arith.constant 0 : i32
    %c0_i32_2 = arith.constant 0 : i32
    %c0_i32_3 = arith.constant 0 : i32
    return %c0_i32, %c0_i32_0, %c0_i32_1, %c0_i32_2 : i32, i32, i32, i32
  }
  func.func @transform_1(%arg0: i32) -> (i32, i32, i32) {
    %c0_i32 = arith.constant 0 : i32
    %c0_i32_0 = arith.constant 0 : i32
    %c0_i32_1 = arith.constant 0 : i32
    %c0_i32_2 = arith.constant 0 : i32
    return %c0_i32, %c0_i32_0, %c0_i32_1 : i32, i32, i32
  }
  func.func @transform_2(%arg0: i32) -> (i32, i32) {
    %c0_i32 = arith.constant 0 : i32
    %c0_i32_0 = arith.constant 0 : i32
    %c0_i32_1 = arith.constant 0 : i32
    return %c0_i32, %c0_i32_0 : i32, i32
  }
  func.func @transform_3(%arg0: i32) -> (i32, i32) {
    %c0_i32 = arith.constant 0 : i32
    %c0_i32_0 = arith.constant 0 : i32
    %c0_i32_1 = arith.constant 0 : i32
    return %c0_i32, %c0_i32_0 : i32, i32
  }
  func.func @transform_4(%arg0: i32) -> (i32, i32) {
    %c0_i32 = arith.constant 0 : i32
    %c0_i32_0 = arith.constant 0 : i32
    %c0_i32_1 = arith.constant 0 : i32
    return %c0_i32, %c0_i32_0 : i32, i32
  }
  func.func @transform_5(%arg0: i32) -> (i32, i32) {
    %c0_i32 = arith.constant 0 : i32
    %c0_i32_0 = arith.constant 0 : i32
    %c0_i32_1 = arith.constant 0 : i32
    return %c0_i32, %c0_i32_0 : i32, i32
  }
  func.func @transform_6(%arg0: i32) -> (i32, i32, i32, i32) {
    %c0_i32 = arith.constant 0 : i32
    %c0_i32_0 = arith.constant 0 : i32
    %c0_i32_1 = arith.constant 0 : i32
    %c0_i32_2 = arith.constant 0 : i32
    %c0_i32_3 = arith.constant 0 : i32
    return %c0_i32, %c0_i32_0, %c0_i32_1, %c0_i32_2 : i32, i32, i32, i32
  }
}

</mosaic_0001>

<bundles_post_ra>
// kernel: tpu_custom_call.1
= control target key start
LH: loop header
LB: loop body
LE: loop exit
PB: predicated region body
PF: predicated region fallthrough
CT: control target
= control target key end

     0   :  { %11 = vsyncpa [#allocation3], 0  ;;  %s5537_s0 = inlined_call_operand.hbm [shape: f32[2,2,16,16], index: 0, kind: input, shape index: {}]   ;;  %s5538_s1 = inlined_call_operand.hbm [shape: f32[2,16,16], index: 1, kind: input, shape index: {}]   ;;  %s5539_s2 = inlined_call_operand.hbm [shape: f32[16,16], index: 2, kind: input, shape index: {}]   ;;  %s5540_s3 = inlined_call_operand.hbm [shape: f32[16,16], index: 3, kind: input, shape index: {}]   ;;  %s5541_s4 = inlined_call_operand.hbm [shape: f32[16,16], index: 4, kind: input, shape index: {}]   ;;  %s5542_s5 = inlined_call_operand.hbm [shape: f32[16,16], index: 5, kind: input, shape index: {}]   ;;  %s5543_s6 = inlined_call_operand.hbm [shape: f32[2,2,16,16], index: 6, kind: output, shape index: {}]  }
   0x1   :  { %12 = vsyncpa [#allocation6], 0 }
   0x2   :  { %13 = vsyncpa [#allocation9], 0 }
   0x3   :  { %14 = vsyncpa [#allocation12], 0 }
   0x4   :  { %15 = vsyncpa [#allocation4], 0  ;;  %s4796_s21 = smov [#allocation5]   ;;  %s4797_s23 = smov [#allocation8]  }
   0x5   :  { %s33_s22 = sshll.u32 %s4796_s21, 4  ;;  %s57_s24 = sshll.u32 %s4797_s23, 4  ;;  %s34_s22 = int_to_ptr.vmem [resolvable:$true] %s33_s22  ;;  %s58_s24 = int_to_ptr.vmem [resolvable:$true] %s57_s24 }
   0x6   :  { %s4654_s25 = scalar_lea.vmem %s34_s22, 512  ;;  %p4659_p1 = scmp.lt.s32.totalorder %s34_s22, %s34_s22 }
   0x7   :  { %p4655_p0 = scmp.ne.s32.totalorder %s34_s22, %s4654_s25  ;;  %p4660_p2 = scmp.lt.s32.totalorder %s4654_s25, %s4654_s25 }
   0x9   :  { %p4661_p3 = por %p4660_p2, %p4659_p1 }
   0xb   :  { %p4662_p4 = pnand %p4661_p3, %p4655_p0 }
   0xd   :  { %4665 = shalt.err (!%p4662_p4)
}
   0xe   :  { %s4798_s26 = smov 128   ;;  %s4799_s27 = smov 8  }
   0xf   :  { %39 = dma.hbm_to_vmem [thread:$0]  %s5538_s1, 512, %s34_s22, [#allocation6], %s4798_s26, %s4798_s26, %s4799_s27  }
  0x10   :  { %s4674_s30 = scalar_lea.vmem %s58_s24, 256  ;;  %p4679_p6 = scmp.lt.s32.totalorder %s58_s24, %s58_s24 }
  0x11   :  { %p4675_p5 = scmp.ne.s32.totalorder %s58_s24, %s4674_s30  ;;  %p4680_p7 = scmp.lt.s32.totalorder %s4674_s30, %s4674_s30 }
  0x13   :  { %p4681_p8 = por %p4680_p7, %p4679_p6 }
  0x15   :  { %p4682_p9 = pnand %p4681_p8, %p4675_p5 }
  0x17   :  { %4685 = shalt.err (!%p4682_p9)
}
  0x18   :  { %63 = dma.hbm_to_vmem [thread:$0]  %s5540_s3, 256, %s58_s24, [#allocation9], %s4798_s26, %s4798_s26, %s4799_s27  }
  0x19   :  { %s4800_s9 = smov [#allocation2]   ;;  %s4801_s11 = smov [#allocation7]  }
  0x1a   :  { %s21_s10 = sshll.u32 %s4800_s9, 4  ;;  %s45_s12 = sshll.u32 %s4801_s11, 4  ;;  %s22_s10 = int_to_ptr.vmem [resolvable:$true] %s21_s10  ;;  %s46_s12 = int_to_ptr.vmem [resolvable:$true] %s45_s12 }
  0x1b   :  { %s4694_s1 = scalar_lea.vmem %s22_s10, 1024  ;;  %p4699_p11 = scmp.lt.s32.totalorder %s22_s10, %s22_s10 }
  0x1c   :  { %p4695_p10 = scmp.ne.s32.totalorder %s22_s10, %s4694_s1  ;;  %p4700_p12 = scmp.lt.s32.totalorder %s4694_s1, %s4694_s1 }
  0x1e   :  { %p4701_p13 = por %p4700_p12, %p4699_p11 }
  0x20   :  { %p4702_p0 = pnand %p4701_p13, %p4695_p10 }
  0x22   :  { %4705 = shalt.err (!%p4702_p0)
}
  0x23   :  { %27 = dma.hbm_to_vmem [thread:$0]  %s5537_s0, 1024, %s22_s10, [#allocation3], %s4798_s26, %s4798_s26, %s4799_s27  }
  0x24   :  { %s4714_s3 = scalar_lea.vmem %s46_s12, 256  ;;  %p4719_p2 = scmp.lt.s32.totalorder %s46_s12, %s46_s12 }
  0x25   :  { %p4715_p1 = scmp.ne.s32.totalorder %s46_s12, %s4714_s3  ;;  %p4720_p3 = scmp.lt.s32.totalorder %s4714_s3, %s4714_s3 }
  0x27   :  { %p4721_p4 = por %p4720_p3, %p4719_p2 }
  0x29   :  { %p4722_p5 = pnand %p4721_p4, %p4715_p1 }
  0x2b   :  { %4725 = shalt.err (!%p4722_p5)
}
  0x2c   :  { %51 = dma.hbm_to_vmem [thread:$0]  %s5539_s2, 256, %s46_s12, [#allocation6], %s4798_s26, %s4798_s26, %s4799_s27  }
  0x2d   :  { %s4802_s17 = smov [#allocation10]   ;;  %s4803_s19 = smov [#allocation11]  }
  0x2e   :  { %s69_s18 = sshll.u32 %s4802_s17, 4  ;;  %s81_s20 = sshll.u32 %s4803_s19, 4  ;;  %s70_s18 = int_to_ptr.vmem [resolvable:$true] %s69_s18  ;;  %s82_s20 = int_to_ptr.vmem [resolvable:$true] %s81_s20 }
  0x2f   :  { %s4734_s0 = scalar_lea.vmem %s70_s18, 256  ;;  %p4739_p7 = scmp.lt.s32.totalorder %s70_s18, %s70_s18 }
  0x30   :  { %p4735_p6 = scmp.ne.s32.totalorder %s70_s18, %s4734_s0  ;;  %p4740_p8 = scmp.lt.s32.totalorder %s4734_s0, %s4734_s0 }
  0x32   :  { %p4741_p9 = por %p4740_p8, %p4739_p7 }
  0x34   :  { %p4742_p10 = pnand %p4741_p9, %p4735_p6 }
  0x36   :  { %4745 = shalt.err (!%p4742_p10)
}
  0x37   :  { %75 = dma.hbm_to_vmem [thread:$0]  %s5541_s4, 256, %s70_s18, [#allocation9], %s4798_s26, %s4798_s26, %s4799_s27  }
  0x38   :  { %s4754_s2 = scalar_lea.vmem %s82_s20, 256  ;;  %p4759_p12 = scmp.lt.s32.totalorder %s82_s20, %s82_s20 }
  0x39   :  { %p4755_p11 = scmp.ne.s32.totalorder %s82_s20, %s4754_s2  ;;  %p4760_p13 = scmp.lt.s32.totalorder %s4754_s2, %s4754_s2 }
  0x3b   :  { %p4761_p0 = por %p4760_p13, %p4759_p12 }
  0x3d   :  { %p4762_p1 = pnand %p4761_p0, %p4755_p11 }
  0x3f   :  { %4765 = shalt.err (!%p4762_p1)
}
  0x40   :  { %87 = dma.hbm_to_vmem [thread:$0]  %s5542_s5, 256, %s82_s20, [#allocation12], %s4798_s26, %s4798_s26, %s4799_s27  }
  0x41   :  { %4786 = dma.done.wait [#allocation3], 1024  }
  0x42   :  { %4787 = vsyncadd [#allocation3], 4294966272 }
  0x43   :  { %4788 = dma.done.wait [#allocation6], 768  }
  0x44   :  { %4789 = vsyncadd [#allocation6], 4294966528 }
  0x45   :  { %4790 = dma.done.wait [#allocation9], 512  }
  0x46   :  { %4791 = vsyncadd [#allocation9], 4294966784 }
  0x47   :  { %4792 = dma.done.wait [#allocation12], 256  }
  0x48   :  { %4793 = vsyncadd [#allocation12], 4294967040  ;;  %v4876_v0 = vld [vmem:[#allocation10 + $0x8] sm:$0xff]  ;;  %v4878_v1 = vld [vmem:[#allocation10] sm:$0xff]  ;;  %vm142_vm0 = vcmask 130048   ;;  %s4804_s4 = smov [#allocation13]  }
  0x49   :  { %v4881_v2 = vand.u32 4294901760, %v4876_v0  ;;  %v4884_v3 = vand.u32 4294901760, %v4878_v1  ;;  %v106_v4 = vld [vmem:[#allocation2] sm:$0xff]  ;;  %v107_v7 = vld [vmem:[#allocation2 + $0x8] sm:$0xff]  ;;  %v116_v13 = vld [vmem:[#allocation5 + $0x10] sm:$0xff]  ;;  %s4045_s5 = sshll.u32 %s4804_s4, 4  ;;  %s4046_s5 = int_to_ptr.vmem [resolvable:$true] %s4045_s5 }
  0x4a   :  { %v114_v5 = vld [vmem:[#allocation5] sm:$0xff]  ;;  %v115_v8 = vld [vmem:[#allocation5 + $0x8] sm:$0xff]  ;;  %v117_v15 = vld [vmem:[#allocation5 + $0x18] sm:$0xff]  ;;  %v120_v17 = vmul.f32 %v116_v13, %v116_v13  ;;  %s4766_s25 = scalar_lea.vmem %s4046_s5, 1024  ;;  %p4771_p3 = scmp.lt.s32.totalorder %s4046_s5, %s4046_s5 }
  0x4b   :  { %v118_v6 = vmul.f32 %v114_v5, %v114_v5  ;;  %v110_v9 = vld [vmem:[#allocation2 + $0x20] sm:$0xff]  ;;  %4276 = vmatprep.subr.mxu0 %v4881_v2  ;;  %v4889_v10 = vsub.f32 %v4876_v0, %v4881_v2  ;;  %v4893_v11 = vsub.f32 %v4878_v1, %v4884_v3  ;;  %v119_v12 = vmul.f32 %v115_v8, %v115_v8  ;;  %v111_v14 = vld [vmem:[#allocation2 + $0x28] sm:$0xff]  ;;  %v108_v34 = vld [vmem:[#allocation2 + $0x10] sm:$0xff]  ;;  %p4767_p2 = scmp.ne.s32.totalorder %s4046_s5, %s4766_s25  ;;  %p4772_p4 = scmp.lt.s32.totalorder %s4766_s25, %s4766_s25 }
  0x4c   :  { %4277 = vmatpush3.msra.mxu0 %v4881_v2  ;;  %v4898_v18 = vmul.f32 %v117_v15, %v117_v15  ;;  %v4912_v23 = vmul.f32 %v120_v17, %v110_v9  ;;  %v4936_v37 = vld [vmem:[#allocation11 + $0x8] sm:$0xff]  ;;  %v4946_v42 = vld [vmem:[#allocation11] sm:$0xff] }
  0x4d   :  { %v4896_v16 = vmul.f32 %v118_v6, %v106_v4  ;;  %v4901_v19 = vand.u32 4294901760, %v4889_v10  ;;  %4278 = vmatprep.subr.mxu0 %v4884_v3  ;;  %v4905_v20 = vand.u32 4294901760, %v4893_v11  ;;  %v4907_v21 = vmul.f32 %v119_v12, %v107_v7  ;;  %v109_v44 = vld [vmem:[#allocation2 + $0x18] sm:$0xff]  ;;  %v112_v53 = vld [vmem:[#allocation2 + $0x30] sm:$0xff]  ;;  %p4773_p5 = por %p4772_p4, %p4771_p3 }
  0x4e   :  { %4279 = vmatpush3.msra.mxu0 %v4884_v3  ;;  %v4915_v24 = vmul.f32 %v4898_v18, %v111_v14  ;;  %v150_v30 = vsel %vm142_vm0, %v4912_v23, 0  ;;  %v4948_v43 = vmul.f32 %v118_v6, %v108_v34  ;;  %v4955_v47 = vand.u32 4294901760, %v4936_v37  ;;  %v113_v61 = vld [vmem:[#allocation2 + $0x38] sm:$0xff] }
  0x4f   :  { %v144_v22 = vsel %vm142_vm0, %v4896_v16, 0  ;;  %v294_v25 = vsub.f32 %v4889_v10, %v4901_v19  ;;  %v301_v26 = vsub.f32 %v4893_v11, %v4905_v20  ;;  %4296 = vmatprep.subr.mxu0 %v4889_v10  ;;  %v147_v28 = vsel %vm142_vm0, %v4907_v21, 0  ;;  %p4774_p6 = pnand %p4773_p5, %p4767_p2 }
  0x50   :  { %v4921_v27 = vand.u32 4294901760, %v144_v22  ;;  %v4926_v29 = vand.u32 4294901760, %v147_v28  ;;  %v153_v31 = vsel %vm142_vm0, %v4915_v24, 0  ;;  %v4934_v36 = vand.u32 4294901760, %v150_v30 }
  0x51   :  { %v295_v32 = vand.u32 4294901760, %v294_v25  ;;  %v302_v33 = vand.u32 4294901760, %v301_v26  ;;  %v4941_v39 = vand.u32 4294901760, %v153_v31  ;;  %v4961_v52 = vand.u32 4294901760, %v4946_v42 }
  0x52   :  { %v223_v35 = vsub.f32 %v144_v22, %v4921_v27  ;;  %4290 = vmatprep.mubr.f32.mxu1 %v4921_v27  ;;  %v4939_v38 = vsub.f32 %v147_v28, %v4926_v29  ;;  %v4944_v41 = vsub.f32 %v150_v30, %v4934_v36  ;;  %v4963_v55 = vmul.f32 %v119_v12, %v109_v44 }
  0x53   :  { %4286 = vmatprep.subr.mxu1 %v295_v32  ;;  %v4952_v46 = vsub.f32 %v153_v31, %v4941_v39  ;;  %v4973_v59 = vsub.f32 %v4936_v37, %v4955_v47  ;;  %v744_v60 = vsel %vm142_vm0, %v4948_v43, 0  ;;  %v4978_v63 = vmul.f32 %v120_v17, %v112_v53 }
  0x54   :  { %v224_v40 = vand.u32 4294901760, %v223_v35  ;;  %4287 = vmatpush3.msra.mxu1 %v295_v32  ;;  %v234_v45 = vand.u32 4294901760, %v4939_v38  ;;  %v244_v49 = vand.u32 4294901760, %v4944_v41  ;;  %v4983_v5 = vsub.f32 %v4946_v42, %v4961_v52 }
  0x55   :  { %4288 = vmatprep.subr.mxu1 %v302_v33  ;;  %v254_v51 = vand.u32 4294901760, %v4952_v46  ;;  %v4986_v6 = vand.u32 4294901760, %v744_v60  ;;  %v747_v7 = vsel %vm142_vm0, %v4963_v55, 0  ;;  %v4991_v8 = vmul.f32 %v4898_v18, %v113_v61 }
  0x56   :  { %v225_v48 = vsub.f32 %v223_v35, %v224_v40  ;;  %4289 = vmatpush3.msra.mxu1 %v302_v33  ;;  %v235_v50 = vsub.f32 %v4939_v38, %v234_v45  ;;  %v245_v56 = vsub.f32 %v4944_v41, %v244_v49  ;;  %v4996_v9 = vand.u32 4294901760, %v4973_v59 }
  0x57   :  { %4291 = vmatmul.mubr.f32.vlgmr.msra.gmra.mxu1 %v4926_v29  ;;  %4306 = vmatprep.subr.mxu1 %v4881_v2  ;;  %v255_v58 = vsub.f32 %v4952_v46, %v254_v51  ;;  %v750_v12 = vsel %vm142_vm0, %v4978_v63, 0  ;;  %v5005_v13 = vand.u32 4294901760, %v747_v7  ;;  %v5009_v14 = vsub.f32 %v744_v60, %v4986_v6 }
  0x58   :  { %v226_v54 = vand.u32 4294901760, %v225_v48  ;;  %v236_v57 = vand.u32 4294901760, %v235_v50  ;;  %4307 = vmatpush3.msra.mxu1 %v4881_v2  ;;  %4293 = vmatprep.mubr.f32.mxu1 %v4934_v36  ;;  %v246_v62 = vand.u32 4294901760, %v245_v56  ;;  %v5011_v15 = vand.u32 4294901760, %v750_v12 }
  0x59   :  { %4308 = vmatprep.subr.mxu1 %v4884_v3  ;;  %v256_v4 = vand.u32 4294901760, %v255_v58  ;;  %v894_v17 = vsub.f32 %v4973_v59, %v4996_v9  ;;  %v5023_v22 = vsub.f32 %v747_v7, %v5005_v13  ;;  %v824_v26 = vand.u32 4294901760, %v5009_v14 }
  0x5a   :  { %4280 = vmatprep.mubr.f32.mxu0 %v226_v54  ;;  %4309 = vmatpush3.msra.mxu1 %v4884_v3  ;;  %v141_v32 = vadd.f32 %v4936_v37, %v4876_v0  ;;  %v140_v34 = vadd.f32 %v4946_v42, %v4878_v1  ;;  %v1345_v42 = vadd.f32 %v4978_v63, %v4912_v23 }
  0x5b   :  { %4281 = vmatmul.mubr.f32.vlgmr.msra.gmra.mxu0 %v236_v57  ;;  %4294 = vmatmul.mubr.f32.gmra.mxu1 %v4941_v39  ;;  %v895_v28 = vand.u32 4294901760, %v894_v17  ;;  %v834_v30 = vand.u32 4294901760, %v5023_v22  ;;  %v1346_v23 = vadd.f32 %v4991_v8, %v4915_v24 }
  0x5c   :  { %4297 = vmatpush3.msra.mxu0 %v4889_v10  ;;  %4283 = vmatprep.mubr.f32.mxu0 %v246_v62  ;;  %v5003_v10 = vand.u32 4294901760, %v4983_v5  ;;  %v5068_v37 = vand.u32 4294901760, %v141_v32  ;;  %v1354_v48 = vsel %vm142_vm0, %v1345_v42, 0 }
  0x5d   :  { %4298 = vmatprep.subr.mxu0 %v4893_v11  ;;  %4310 = vmatprep.mubr.f32.mxu1 %v224_v40  ;;  %v1357_v53 = vsel %vm142_vm0, %v1346_v23, 0 }
  0x5e   :  { %4299 = vmatpush3.msra.mxu0 %v4893_v11  ;;  %4326 = vmatprep.subr.mxu1 %v4881_v2  ;;  %v753_v11 = vsel %vm142_vm0, %v4991_v8, 0  ;;  %v901_v18 = vsub.f32 %v4983_v5, %v5003_v10  ;;  %v5139_v57 = vand.u32 4294901760, %v1357_v53 }
  0x5f   :  { %4284 = vmatmul.mubr.f32.gmra.mxu0 %v256_v4  ;;  %4316 = vmatprep.subr.mxu0 %v4901_v19  ;;  %v5025_v25 = vand.u32 4294901760, %v753_v11 }
  0x60   :  { %4300 = vmatprep.mubr.f32.mxu0 %v223_v35  ;;  %4311 = vmatmul.mubr.f32.vlgmr.msra.gmra.mxu1 %v234_v45  ;;  %v1457_v62 = vsub.f32 %v1357_v53, %v5139_v57 }
  0x61   :  { %4327 = vmatpush3.msra.mxu1 %v4881_v2  ;;  %4313 = vmatprep.mubr.f32.mxu1 %v244_v49  ;;  %v5031_v2 = vsub.f32 %v750_v12, %v5011_v15  ;;  %v5040_v31 = vsub.f32 %v753_v11, %v5025_v25 }
  0x62   :  { %4328 = vmatprep.subr.mxu1 %v4884_v3 }
  0x63   :  { %4301 = vmatmul.mubr.f32.vlgmr.msra.gmra.mxu0 %v4939_v38  ;;  %4329 = vmatpush3.msra.mxu1 %v4884_v3  ;;  %v844_v3 = vand.u32 4294901760, %v5031_v2  ;;  %v854_v33 = vand.u32 4294901760, %v5040_v31  ;;  %v5076_v38 = vand.u32 4294901760, %v140_v34 }
  0x64   :  { %4317 = vmatpush3.msra.mxu0 %v4901_v19  ;;  %4303 = vmatprep.mubr.f32.mxu0 %v4944_v41  ;;  %v902_v19 = vand.u32 4294901760, %v901_v18 }
  0x65   :  { %4318 = vmatprep.subr.mxu0 %v4905_v20  ;;  %4314 = vmatmul.mubr.f32.gmra.mxu1 %v254_v51  ;;  %v845_v35 = vsub.f32 %v5031_v2, %v844_v3  ;;  %v5121_v51 = vand.u32 4294901760, %v1354_v48 }
  0x66   :  { %4319 = vmatpush3.msra.mxu0 %v4905_v20  ;;  %4330 = vmatprep.mubr.f32.mxu1 %v4921_v27  ;;  %v825_v20 = vsub.f32 %v5009_v14, %v824_v26 }
  0x67   :  { %4304 = vmatmul.mubr.f32.gmra.mxu0 %v4952_v46  ;;  %4336 = vmatprep.subr.mxu0 %v4955_v47  ;;  %v846_v40 = vand.u32 4294901760, %v845_v35  ;;  %v1447_v58 = vsub.f32 %v1354_v48, %v5121_v51 }
  0x68   :  { %4320 = vmatprep.mubr.f32.mxu0 %v4921_v27  ;;  %4346 = vmatprep.subr.mxu1 %v895_v28  ;;  %v835_v27 = vsub.f32 %v5023_v22, %v834_v30  ;;  %v826_v0 = vand.u32 4294901760, %v825_v20 }
  0x69   :  { %4331 = vmatmul.mubr.f32.vlgmr.msra.gmra.mxu1 %v4926_v29  ;;  %v1448_v4 = vand.u32 4294901760, %v1447_v58 }
  0x6a   :  { %4347 = vmatpush3.msra.mxu1 %v895_v28  ;;  %4333 = vmatprep.mubr.f32.mxu1 %v4934_v36  ;;  %v836_v1 = vand.u32 4294901760, %v835_v27 }
  0x6b   :  { %4321 = vmatmul.mubr.f32.vlgmr.msra.gmra.mxu0 %v4926_v29  ;;  %4348 = vmatprep.subr.mxu1 %v902_v19  ;;  %v1343_v29 = vadd.f32 %v4948_v43, %v4896_v16  ;;  %v1344_v16 = vadd.f32 %v4963_v55, %v4907_v21  ;;  %v5093_v43 = vsub.f32 %v140_v34, %v5076_v38 }
  0x6c   :  { %4337 = vmatpush3.msra.mxu0 %v4955_v47  ;;  %4323 = vmatprep.mubr.f32.mxu0 %v4934_v36  ;;  %v855_v36 = vsub.f32 %v5040_v31, %v854_v33  ;;  %v1449_v7 = vsub.f32 %v1447_v58, %v1448_v4 }
  0x6d   :  { %4338 = vmatprep.subr.mxu0 %v4961_v52  ;;  %4334 = vmatmul.mubr.f32.gmra.mxu1 %v4941_v39  ;;  %v1348_v41 = vsel %vm142_vm0, %v1343_v29, 0  ;;  %v1351_v44 = vsel %vm142_vm0, %v1344_v16, 0  ;;  %v5114_v24 = vand.u32 4294901760, %v5093_v43 }
  0x6e   :  { %4339 = vmatpush3.msra.mxu0 %v4961_v52  ;;  %4349 = vmatpush3.msra.mxu1 %v902_v19  ;;  %v856_v21 = vand.u32 4294901760, %v855_v36  ;;  %v5097_v45 = vand.u32 4294901760, %v1348_v41  ;;  %v5109_v49 = vand.u32 4294901760, %v1351_v44  ;;  %v1450_v12 = vand.u32 4294901760, %v1449_v7 }
  0x6f   :  { %4324 = vmatmul.mubr.f32.gmra.mxu0 %v4941_v39  ;;  %4350 = vmatprep.mubr.f32.mxu1 %v4986_v6  ;;  %v5084_v39 = vsub.f32 %v141_v32, %v5068_v37  ;;  %v1505_v55 = vsub.f32 %v5093_v43, %v5114_v24 }
  0x70   :  { %4340 = vmatprep.mubr.f32.mxu0 %v826_v0  ;;  %4356 = vmatprep.subr.mxu0 %v4973_v59  ;;  %v5119_v50 = vsub.f32 %v1348_v41, %v5097_v45  ;;  %v5137_v56 = vsub.f32 %v1351_v44, %v5109_v49 }
  0x71   :  { %4351 = vmatmul.mubr.f32.vlgmr.msra.gmra.mxu1 %v5005_v13  ;;  %4366 = vmatprep.subr.mxu1 %v4955_v47  ;;  %v5104_v46 = vand.u32 4294901760, %v5084_v39  ;;  %v1506_v60 = vand.u32 4294901760, %v1505_v55 }
  0x72   :  { %4367 = vmatpush3.msra.mxu1 %v4955_v47  ;;  %4353 = vmatprep.mubr.f32.mxu1 %v5011_v15  ;;  %v1438_v61 = vand.u32 4294901760, %v5137_v56 }
  0x73   :  { %4341 = vmatmul.mubr.f32.vlgmr.msra.gmra.mxu0 %v836_v1  ;;  %4368 = vmatprep.subr.mxu1 %v4961_v52  ;;  %v1498_v54 = vsub.f32 %v5084_v39, %v5104_v46 }
  0x74   :  { %4357 = vmatpush3.msra.mxu0 %v4973_v59  ;;  %4343 = vmatprep.mubr.f32.mxu0 %v846_v40 }
  0x75   :  { %4358 = vmatprep.subr.mxu0 %v4983_v5  ;;  %4354 = vmatmul.mubr.f32.gmra.mxu1 %v5025_v25  ;;  %v1499_v59 = vand.u32 4294901760, %v1498_v54 }
  0x76   :  { %4359 = vmatpush3.msra.mxu0 %v4983_v5  ;;  %4369 = vmatpush3.msra.mxu1 %v4961_v52  ;;  %v1458_v5 = vand.u32 4294901760, %v1457_v62 }
  0x77   :  { %4344 = vmatmul.mubr.f32.gmra.mxu0 %v856_v21  ;;  %4370 = vmatprep.mubr.f32.mxu1 %v824_v26 }
  0x78   :  { %4360 = vmatprep.mubr.f32.mxu0 %v5009_v14  ;;  %4376 = vmatprep.subr.mxu0 %v4996_v9 }
  0x79   :  { %4371 = vmatmul.mubr.f32.vlgmr.msra.gmra.mxu1 %v834_v30  ;;  %4386 = vmatprep.subr.mxu1 %v4955_v47 }
  0x7a   :  { %4387 = vmatpush3.msra.mxu1 %v4955_v47  ;;  %4373 = vmatprep.mubr.f32.mxu1 %v844_v3  ;;  %v1428_v47 = vand.u32 4294901760, %v5119_v50 }
  0x7b   :  { %4361 = vmatmul.mubr.f32.vlgmr.msra.gmra.mxu0 %v5023_v22  ;;  %4388 = vmatprep.subr.mxu1 %v4961_v52 }
  0x7c   :  { %4377 = vmatpush3.msra.mxu0 %v4996_v9  ;;  %4363 = vmatprep.mubr.f32.mxu0 %v5031_v2  ;;  %v1429_v63 = vsub.f32 %v5119_v50, %v1428_v47  ;;  %v1459_v9 = vsub.f32 %v1457_v62, %v1458_v5 }
  0x7d   :  { %4378 = vmatprep.subr.mxu0 %v5003_v10  ;;  %4374 = vmatmul.mubr.f32.gmra.mxu1 %v854_v33 }
  0x7e   :  { %4379 = vmatpush3.msra.mxu0 %v5003_v10  ;;  %4389 = vmatpush3.msra.mxu1 %v4961_v52  ;;  %v1439_v52 = vsub.f32 %v5137_v56, %v1438_v61  ;;  %v1460_v10 = vand.u32 4294901760, %v1459_v9 }
  0x7f   :  { %4364 = vmatmul.mubr.f32.gmra.mxu0 %v5040_v31  ;;  %4390 = vmatprep.mubr.f32.mxu1 %v4986_v6 }
  0x80   :  { %4380 = vmatprep.mubr.f32.mxu0 %v4986_v6  ;;  %4396 = vmatprep.subr.mxu0 %v5068_v37  ;;  %v1430_v6 = vand.u32 4294901760, %v1429_v63  ;;  %v1440_v8 = vand.u32 4294901760, %v1439_v52 }
  0x81   :  { %4391 = vmatmul.mubr.f32.vlgmr.msra.gmra.mxu1 %v5005_v13  ;;  %4406 = vmatprep.subr.mxu1 %v1499_v59 }
  0x82   :  { %4407 = vmatpush3.msra.mxu1 %v1499_v59  ;;  %4393 = vmatprep.mubr.f32.mxu1 %v5011_v15 }
  0x83   :  { %4381 = vmatmul.mubr.f32.vlgmr.msra.gmra.mxu0 %v5005_v13  ;;  %4408 = vmatprep.subr.mxu1 %v1506_v60 }
  0x84   :  { %4397 = vmatpush3.msra.mxu0 %v5068_v37  ;;  %4383 = vmatprep.mubr.f32.mxu0 %v5011_v15 }
  0x85   :  { %4398 = vmatprep.subr.mxu0 %v5076_v38  ;;  %4394 = vmatmul.mubr.f32.gmra.mxu1 %v5025_v25 }
  0x86   :  { %4399 = vmatpush3.msra.mxu0 %v5076_v38  ;;  %4409 = vmatpush3.msra.mxu1 %v1506_v60 }
  0x87   :  { %4384 = vmatmul.mubr.f32.gmra.mxu0 %v5025_v25  ;;  %4410 = vmatprep.mubr.f32.mxu1 %v5097_v45 }
  0x88   :  { %4400 = vmatprep.mubr.f32.mxu0 %v1430_v6  ;;  %4416 = vmatprep.subr.mxu0 %v5084_v39 }
  0x89   :  { %4411 = vmatmul.mubr.f32.vlgmr.msra.gmra.mxu1 %v5109_v49  ;;  %4426 = vmatprep.subr.mxu1 %v5068_v37 }
  0x8a   :  { %4427 = vmatpush3.msra.mxu1 %v5068_v37  ;;  %4413 = vmatprep.mubr.f32.mxu1 %v5121_v51 }
  0x8b   :  { %4401 = vmatmul.mubr.f32.vlgmr.msra.gmra.mxu0 %v1440_v8  ;;  %4428 = vmatprep.subr.mxu1 %v5076_v38 }
  0x8c   :  { %4417 = vmatpush3.msra.mxu0 %v5084_v39  ;;  %4403 = vmatprep.mubr.f32.mxu0 %v1450_v12  ;;  %v5212_v12 = vld [vmem:[#allocation7] sm:$0xff] }
  0x8d   :  { %4418 = vmatprep.subr.mxu0 %v5093_v43  ;;  %4414 = vmatmul.mubr.f32.gmra.mxu1 %v5139_v57 }
  0x8e   :  { %4419 = vmatpush3.msra.mxu0 %v5093_v43  ;;  %4429 = vmatpush3.msra.mxu1 %v5076_v38 }
  0x8f   :  { %4404 = vmatmul.mubr.f32.gmra.mxu0 %v1460_v10  ;;  %4430 = vmatprep.mubr.f32.mxu1 %v1428_v47 }
  0x90   :  { %4420 = vmatprep.mubr.f32.mxu0 %v5119_v50  ;;  %4436 = vmatprep.subr.mxu0 %v5104_v46 }
  0x91   :  { %4431 = vmatmul.mubr.f32.vlgmr.msra.gmra.mxu1 %v1438_v61  ;;  %4446 = vmatprep.subr.mxu1 %v5068_v37  ;;  %v5207_v61 = vld [vmem:[#allocation7 + $0x8] sm:$0xff] }
  0x92   :  { %4447 = vmatpush3.msra.mxu1 %v5068_v37  ;;  %4433 = vmatprep.mubr.f32.mxu1 %v1448_v4  ;;  %v5210_v4 = vand.u32 4294901760, %v5207_v61 }
  0x93   :  { %4421 = vmatmul.mubr.f32.vlgmr.msra.gmra.mxu0 %v5137_v56  ;;  %4448 = vmatprep.subr.mxu1 %v5076_v38 }
  0x94   :  { %4437 = vmatpush3.msra.mxu0 %v5104_v46  ;;  %4423 = vmatprep.mubr.f32.mxu0 %v1447_v58 }
  0x95   :  { %4438 = vmatprep.subr.mxu0 %v5114_v24  ;;  %4434 = vmatmul.mubr.f32.gmra.mxu1 %v1458_v5 }
  0x96   :  { %4439 = vmatpush3.msra.mxu0 %v5114_v24  ;;  %4449 = vmatpush3.msra.mxu1 %v5076_v38 }
  0x97   :  { %4424 = vmatmul.mubr.f32.gmra.mxu0 %v1457_v62  ;;  %4450 = vmatprep.mubr.f32.mxu1 %v5097_v45 }
  0x98   :  { %4440 = vmatprep.mubr.f32.mxu0 %v5097_v45  ;;  %4456 = vmatprep.subr.mxu0 %v5210_v4 }
  0x99   :  { %4451 = vmatmul.mubr.f32.vlgmr.msra.gmra.mxu1 %v5109_v49 }
  0x9a   :  { %4453 = vmatprep.mubr.f32.mxu1 %v5121_v51 }
  0x9b   :  { %4441 = vmatmul.mubr.f32.vlgmr.msra.gmra.mxu0 %v5109_v49 }
  0x9c   :  { %4443 = vmatprep.mubr.f32.mxu0 %v5121_v51  ;;  %4457 = vmatpush3.msra.mxu0 %v5210_v4 }
  0x9d   :  { %4454 = vmatmul.mubr.f32.gmra.mxu1 %v5139_v57 }
  0x9f   :  { %4444 = vmatmul.mubr.f32.gmra.mxu0 %v5139_v57 }
 0x117   :  { %v4292_v13 = vpop.f32.mrf.mxu1 }
 0x119   :  { %v339_v14 = vpop.f32.mrf.mxu1 }
 0x11b   :  { %v4282_v15 = vpop.f32.mrf.mxu0  ;;  %v4295_v17 = vpop.f32.mrf.mxu1 }
 0x11c   :  { %v346_v50 = vadd.f32 %v4292_v13, %v4282_v15  ;;  %v5219_v15 = vand.u32 4294901760, %v5212_v12 }
 0x11d   :  { %v228_v11 = vpop.f32.mrf.mxu0  ;;  %v351_v22 = vpop.f32.mrf.mxu1 }
 0x11e   :  { %v340_v43 = vadd.f32 %v339_v14, %v228_v11  ;;  %v5216_v14 = vsub.f32 %v5207_v61, %v5210_v4  ;;  %4458 = vmatprep.subr.mxu0 %v5219_v15 }
 0x11f   :  { %v4285_v18 = vpop.f32.mrf.mxu0  ;;  %4459 = vmatpush3.msra.mxu0 %v5219_v15 }
 0x120   :  { %v4312_v26 = vpop.f32.mrf.mxu1  ;;  %v358_v52 = vadd.f32 %v4295_v17, %v4285_v18  ;;  %4476 = vmatprep.subr.mxu0 %v5216_v14 }
 0x121   :  { %v248_v25 = vpop.f32.mrf.mxu0 }
 0x122   :  { %v529_v28 = vpop.f32.mrf.mxu1  ;;  %v352_v51 = vadd.f32 %v351_v22, %v248_v25 }
 0x123   :  { %v4302_v2 = vpop.f32.mrf.mxu0 }
 0x124   :  { %v441_v57 = vadd.f32 %v4302_v2, %v346_v50 }
 0x125   :  { %v433_v19 = vpop.f32.mrf.mxu0  ;;  %v5197_v30 = vpop.f32.mrf.mxu1 }
 0x126   :  { %v434_v23 = vadd.f32 %v433_v19, %v340_v43  ;;  %v538_v11 = vadd.f32 %v4312_v26, %v441_v57  ;;  %v5224_v19 = vand.u32 4294901760, %v5216_v14 }
 0x127   :  { %v4305_v31 = vpop.f32.mrf.mxu0  ;;  %v545_v20 = vpop.f32.mrf.mxu1 }
 0x128   :  { %v530_v47 = vadd.f32 %v529_v28, %v434_v23  ;;  %v455_v17 = vadd.f32 %v4305_v31, %v358_v52 }
 0x129   :  { %v447_v3 = vpop.f32.mrf.mxu0  ;;  %v5199_v32 = vpop.f32.mrf.mxu1 }
 0x12a   :  { %v448_v58 = vadd.f32 %v447_v3, %v352_v51  ;;  %v5228_v3 = vsub.f32 %v5212_v12, %v5219_v15 }
 0x12b   :  { %v4322_v27 = vpop.f32.mrf.mxu0  ;;  %v721_v33 = vpop.f32.mrf.mxu1 }
 0x12c   :  { %v546_v18 = vadd.f32 %v545_v20, %v448_v58 }
 0x12d   :  { %v630_v34 = vpop.f32.mrf.mxu0  ;;  %v5201_v0 = vpop.f32.mrf.mxu1 }
 0x12e   :  { %v631_v5 = vadd.f32 %v630_v34, %v530_v47  ;;  %v637_v34 = vadd.f32 %v4322_v27, %v538_v11 }
 0x12f   :  { %v5203_v35 = vpop.f32.mrf.mxu0  ;;  %v5205_v29 = vpop.f32.mrf.mxu1 }
 0x131   :  { %v642_v37 = vpop.f32.mrf.mxu0  ;;  %v4352_v1 = vpop.f32.mrf.mxu1 }
 0x132   :  { %v643_v26 = vadd.f32 %v642_v37, %v546_v18  ;;  %v5243_v37 = vand.u32 4294901760, %v5228_v3 }
 0x133   :  { %v4342_v36 = vpop.f32.mrf.mxu0  ;;  %v939_v38 = vpop.f32.mrf.mxu1 }
 0x134   :  { %v946_v46 = vadd.f32 %v4352_v1, %v4342_v36  ;;  %v5231_v1 = vadd.f32 %v721_v33, %v631_v5 }
 0x135   :  { %v828_v16 = vpop.f32.mrf.mxu0  ;;  %v4355_v40 = vpop.f32.mrf.mxu1 }
 0x136   :  { %v940_v48 = vadd.f32 %v939_v38, %v828_v16 }
 0x137   :  { %v4345_v39 = vpop.f32.mrf.mxu0  ;;  %v951_v41 = vpop.f32.mrf.mxu1 }
 0x138   :  { %v958_v62 = vadd.f32 %v4355_v40, %v4345_v39  ;;  %v2238_v40 = vsub.f32 %v5216_v14, %v5224_v19  ;;  %v554_v39 = vadd.f32 %v5197_v30, %v455_v17  ;;  %v2245_v30 = vsub.f32 %v5228_v3, %v5243_v37 }
 0x139   :  { %v848_v42 = vpop.f32.mrf.mxu0  ;;  %v4372_v21 = vpop.f32.mrf.mxu1 }
 0x13a   :  { %v952_v63 = vadd.f32 %v951_v41, %v848_v42 }
 0x13b   :  { %v4362_v44 = vpop.f32.mrf.mxu0  ;;  %v1129_v45 = vpop.f32.mrf.mxu1 }
 0x13c   :  { %v1041_v53 = vadd.f32 %v4362_v44, %v946_v46  ;;  %v2239_v44 = vand.u32 4294901760, %v2238_v40 }
 0x13d   :  { %v1033_v49 = vpop.f32.mrf.mxu0  ;;  %v4375_v24 = vpop.f32.mrf.mxu1 }
 0x13e   :  { %v1034_v54 = vadd.f32 %v1033_v49, %v940_v48  ;;  %v1138_v6 = vadd.f32 %v4372_v21, %v1041_v53  ;;  %v649_v48 = vadd.f32 %v5203_v35, %v554_v39  ;;  %v5254_v49 = vadd.f32 %v5205_v29, %v643_v26  ;;  %4466 = vmatprep.subr.mxu1 %v2239_v44 }
 0x13f   :  { %v4365_v55 = vpop.f32.mrf.mxu0  ;;  %v1145_v56 = vpop.f32.mrf.mxu1  ;;  %4467 = vmatpush3.msra.mxu1 %v2239_v44  ;;  %v2246_v53 = vand.u32 4294901760, %v2245_v30 }
 0x140   :  { %v1130_v7 = vadd.f32 %v1129_v45, %v1034_v54  ;;  %v1055_v10 = vadd.f32 %v4365_v55, %v958_v62  ;;  %v5248_v45 = vadd.f32 %v5199_v32, %v637_v34  ;;  %v740_v29 = vadd.f32 %v5201_v0, %v649_v48 }
 0x141   :  { %v1047_v59 = vpop.f32.mrf.mxu0  ;;  %v4392_v60 = vpop.f32.mrf.mxu1  ;;  %4468 = vmatprep.subr.mxu1 %v2246_v53 }
 0x142   :  { %v1048_v13 = vadd.f32 %v1047_v59, %v952_v63  ;;  %v1154_v36 = vadd.f32 %v4375_v24, %v1055_v10  ;;  %4469 = vmatpush3.msra.mxu1 %v2246_v53 }
 0x143   :  { %v4382_v8 = vpop.f32.mrf.mxu0  ;;  %v1321_v9 = vpop.f32.mrf.mxu1  ;;  %4486 = vmatprep.subr.mxu1 %v5210_v4 }
 0x144   :  { %v1237_v22 = vadd.f32 %v4382_v8, %v1138_v6  ;;  %v1146_v38 = vadd.f32 %v1145_v56, %v1048_v13 }
 0x145   :  { %v1230_v25 = vpop.f32.mrf.mxu0  ;;  %v4395_v2 = vpop.f32.mrf.mxu1 }
 0x146   :  { %v1231_v28 = vadd.f32 %v1230_v25, %v1130_v7  ;;  %v5240_v41 = vadd.f32 %v4392_v60, %v1237_v22 }
 0x147   :  { %v4385_v31 = vpop.f32.mrf.mxu0  ;;  %v1333_v20 = vpop.f32.mrf.mxu1 }
 0x148   :  { %v5234_v16 = vadd.f32 %v1321_v9, %v1231_v28  ;;  %v1249_v42 = vadd.f32 %v4385_v31, %v1154_v36  ;;  %v1948_v54 = vsub.f32 %v5248_v45, %v5240_v41 }
 0x149   :  { %v1242_v27 = vpop.f32.mrf.mxu0  ;;  %v4412_v33 = vpop.f32.mrf.mxu1 }
 0x14a   :  { %v1243_v21 = vadd.f32 %v1242_v27, %v1146_v38  ;;  %v1947_v43 = vsub.f32 %v5231_v1, %v5234_v16  ;;  %v1340_v32 = vadd.f32 %v4395_v2, %v1249_v42 }
 0x14b   :  { %v4402_v23 = vpop.f32.mrf.mxu0  ;;  %v1543_v46 = vpop.f32.mrf.mxu1 }
 0x14c   :  { %v5256_v24 = vadd.f32 %v1333_v20, %v1243_v21  ;;  %1959 = vxpose.xlu0.b32.start [1/2] (short) (narrow) %v1947_v43, 16  ;;  %v1950_v58 = vsub.f32 %v740_v29, %v1340_v32  ;;  %v1550_v62 = vadd.f32 %v4412_v33, %v4402_v23 }
 0x14d   :  { %v1432_v50 = vpop.f32.mrf.mxu0  ;;  %v4415_v51 = vpop.f32.mrf.mxu1 }
 0x14e   :  { %v1949_v55 = vsub.f32 %v5254_v49, %v5256_v24  ;;  %v1544_v5 = vadd.f32 %v1543_v46, %v1432_v50 }
 0x14f   :  { %v4405_v56 = vpop.f32.mrf.mxu0  ;;  %v1555_v35 = vpop.f32.mrf.mxu1 }
 0x150   :  { %1960 = vxpose.xlu0.b32.end [2/2] (short) (narrow) %v1948_v54, 16  ;;  %1991 = vxpose.xlu1.b32.start [1/2] (short) (narrow) %v1949_v55, 16  ;;  %v1562_v9 = vadd.f32 %v4415_v51, %v4405_v56  ;;  %v5272_v56 = vld [vmem:[#allocation8 + $0x8] sm:$0xff] }
 0x151   :  { %v1452_v57 = vpop.f32.mrf.mxu0  ;;  %v4432_v47 = vpop.f32.mrf.mxu1 }
 0x152   :  { %v1556_v11 = vadd.f32 %v1555_v35, %v1452_v57 }
 0x153   :  { %v4422_v59 = vpop.f32.mrf.mxu0  ;;  %v1733_v60 = vpop.f32.mrf.mxu1 }
 0x154   :  { %1992 = vxpose.xlu1.b32.end [2/2] (short) (narrow) %v1950_v58, 16  ;;  %v1645_v6 = vadd.f32 %v4422_v59, %v1550_v62 }
 0x155   :  { %v1637_v63 = vpop.f32.mrf.mxu0  ;;  %v4435_v52 = vpop.f32.mrf.mxu1 }
 0x156   :  { %v1638_v0 = vadd.f32 %v1637_v63, %v1544_v5  ;;  %v1742_v17 = vadd.f32 %v4432_v47, %v1645_v6 }
 0x157   :  { %v4425_v7 = vpop.f32.mrf.mxu0  ;;  %v1749_v8 = vpop.f32.mrf.mxu1 }
 0x158   :  { %v1659_v18 = vadd.f32 %v4425_v7, %v1562_v9  ;;  %v1734_v2 = vadd.f32 %v1733_v60, %v1638_v0 }
 0x159   :  { %v1651_v10 = vpop.f32.mrf.mxu0  ;;  %v4452_v13 = vpop.f32.mrf.mxu1 }
 0x15a   :  { %v1652_v28 = vadd.f32 %v1651_v10, %v1556_v11  ;;  %v1758_v31 = vadd.f32 %v4435_v52, %v1659_v18 }
 0x15b   :  { %v4442_v22 = vpop.f32.mrf.mxu0  ;;  %v1925_v25 = vpop.f32.mrf.mxu1 }
 0x15c   :  { %v1841_v34 = vadd.f32 %v4442_v22, %v1742_v17  ;;  %v1750_v40 = vadd.f32 %v1749_v8, %v1652_v28 }
 0x15d   :  { %v1834_v26 = vpop.f32.mrf.mxu0  ;;  %v4455_v38 = vpop.f32.mrf.mxu1 }
 0x15e   :  { %v1835_v20 = vadd.f32 %v1834_v26, %v1734_v2  ;;  %v1932_v39 = vadd.f32 %v4452_v13, %v1841_v34 }
 0x15f   :  { %v4445_v36 = vpop.f32.mrf.mxu0  ;;  %v1937_v44 = vpop.f32.mrf.mxu1 }
 0x160   :  { %v1926_v27 = vadd.f32 %v1925_v25, %v1835_v20  ;;  %v1853_v33 = vadd.f32 %v4445_v36, %v1758_v31  ;;  %v1952_v23 = vsub.f32 %v1932_v39, %v5248_v45 }
 0x161   :  { %v1846_v42 = vpop.f32.mrf.mxu0 }
 0x162   :  { %v1951_v21 = vsub.f32 %v1926_v27, %v5231_v1  ;;  %v1847_v43 = vadd.f32 %v1846_v42, %v1750_v40  ;;  %v1944_v46 = vadd.f32 %v4455_v38, %v1853_v33  ;;  %v1956_v53 = vsub.f32 %v1952_v23, %v5240_v41 }
 0x164   :  { %v1938_v30 = vadd.f32 %v1937_v44, %v1847_v43  ;;  %v1955_v48 = vsub.f32 %v1951_v21, %v5234_v16  ;;  %v1954_v51 = vsub.f32 %v1944_v46, %v740_v29 }
 0x166   :  { %v1953_v50 = vsub.f32 %v1938_v30, %v5254_v49  ;;  %2023 = vxpose.xlu0.b32.start [1/2] (short) (narrow) %v1955_v48, 16  ;;  %v1958_v55 = vsub.f32 %v1954_v51, %v1340_v32  ;;  %v5279_v49 = vand.u32 4294901760, %v5272_v56  ;;  %v5287_v32 = vld [vmem:[#allocation8] sm:$0xff] }
 0x167   :  { %v5302_v62 = vand.u32 4294901760, %v5287_v32  ;;  %v138_v43 = vadd.f32 %v5287_v32, %v5212_v12 }
 0x168   :  { %v1957_v54 = vsub.f32 %v1953_v50, %v5256_v24  ;;  %v5299_v60 = vsub.f32 %v5272_v56, %v5279_v49 }
 0x169   :  { %v5322_v11 = vsub.f32 %v5287_v32, %v5302_v62 }
 0x16a   :  { %2024 = vxpose.xlu0.b32.end [2/2] (short) (narrow) %v1956_v53, 16  ;;  %2055 = vxpose.xlu1.b32.start [1/2] (short) (narrow) %v1957_v54, 16  ;;  %v5318_v13 = vand.u32 4294901760, %v5299_v60  ;;  %v5391_v53 = vand.u32 4294901760, %v138_v43 }
 0x16b   :  { %v5330_v26 = vand.u32 4294901760, %v5322_v11 }
 0x16c   :  { %v2838_v34 = vsub.f32 %v5299_v60, %v5318_v13 }
 0x16d   :  { %v2845_v38 = vsub.f32 %v5322_v11, %v5330_v26 }
 0x16e   :  { %2056 = vxpose.xlu1.b32.end [2/2] (short) (narrow) %v1958_v55, 16  ;;  %v2839_v36 = vand.u32 4294901760, %v2838_v34 }
 0x1c8   :  { %v5270_v1 = vpop.trf.xlu0 }
 0x1c9   :  { %v2088_v45 = vsel %vm142_vm0, %v5270_v1, 0 }
 0x1ca   :  { %v5276_v16 = vand.u32 4294901760, %v2088_v45 }
 0x1cc   :  { %v2167_v41 = vsub.f32 %v2088_v45, %v5276_v16  ;;  %v5282_v35 = vpop.trf.xlu0  ;;  %v5284_v24 = vpop.trf.xlu1  ;;  %4470 = vmatprep.mubr.f32.mxu1 %v5276_v16 }
 0x1cd   :  { %v2091_v29 = vsel %vm142_vm0, %v5282_v35, 0  ;;  %v2094_v57 = vsel %vm142_vm0, %v5284_v24, 0 }
 0x1ce   :  { %v5293_v47 = vand.u32 4294901760, %v2091_v29  ;;  %v5295_v58 = vand.u32 4294901760, %v2094_v57  ;;  %v2168_v59 = vand.u32 4294901760, %v2167_v41 }
 0x1d0   :  { %v2177_v63 = vsub.f32 %v2091_v29, %v5293_v47  ;;  %v2187_v52 = vsub.f32 %v2094_v57, %v5295_v58  ;;  %4471 = vmatmul.mubr.f32.vlgmr.msra.gmra.mxu1 %v5293_v47  ;;  %v5307_v5 = vpop.trf.xlu1  ;;  %v2169_v6 = vsub.f32 %v2167_v41, %v2168_v59 }
 0x1d1   :  { %v2097_v7 = vsel %vm142_vm0, %v5307_v5, 0  ;;  %4473 = vmatprep.mubr.f32.mxu1 %v5295_v58  ;;  %4487 = vmatpush3.msra.mxu1 %v5210_v4 }
 0x1d2   :  { %v2178_v8 = vand.u32 4294901760, %v2177_v63  ;;  %v5313_v9 = vand.u32 4294901760, %v2097_v7  ;;  %v2170_v0 = vand.u32 4294901760, %v2169_v6  ;;  %4488 = vmatprep.subr.mxu1 %v5219_v15  ;;  %v2188_v10 = vand.u32 4294901760, %v2187_v52 }
 0x1d3   :  { %4489 = vmatpush3.msra.mxu1 %v5219_v15 }
 0x1d4   :  { %v2179_v17 = vsub.f32 %v2177_v63, %v2178_v8  ;;  %v2197_v18 = vsub.f32 %v2097_v7, %v5313_v9  ;;  %4460 = vmatprep.mubr.f32.mxu0 %v2170_v0  ;;  %4474 = vmatmul.mubr.f32.gmra.mxu1 %v5313_v9  ;;  %v2189_v22 = vsub.f32 %v2187_v52, %v2188_v10 }
 0x1d5   :  { %4490 = vmatprep.mubr.f32.mxu1 %v2168_v59  ;;  %4506 = vmatprep.subr.mxu1 %v5210_v4 }
 0x1d6   :  { %v2180_v25 = vand.u32 4294901760, %v2179_v17  ;;  %v2190_v2 = vand.u32 4294901760, %v2189_v22  ;;  %v2198_v28 = vand.u32 4294901760, %v2197_v18 }
 0x1d8   :  { %4461 = vmatmul.mubr.f32.vlgmr.msra.gmra.mxu0 %v2180_v25  ;;  %4491 = vmatmul.mubr.f32.vlgmr.msra.gmra.mxu1 %v2178_v8  ;;  %v2199_v31 = vsub.f32 %v2197_v18, %v2198_v28 }
 0x1d9   :  { %4463 = vmatprep.mubr.f32.mxu0 %v2190_v2  ;;  %4493 = vmatprep.mubr.f32.mxu1 %v2188_v10 }
 0x1da   :  { %4477 = vmatpush3.msra.mxu0 %v5216_v14  ;;  %v2200_v20 = vand.u32 4294901760, %v2199_v31  ;;  %4507 = vmatpush3.msra.mxu1 %v5210_v4  ;;  %v2846_v4 = vand.u32 4294901760, %v2845_v38 }
 0x1db   :  { %4478 = vmatprep.subr.mxu0 %v5228_v3  ;;  %4508 = vmatprep.subr.mxu1 %v5219_v15 }
 0x1dc   :  { %4464 = vmatmul.mubr.f32.gmra.mxu0 %v2200_v20  ;;  %4494 = vmatmul.mubr.f32.gmra.mxu1 %v2198_v28 }
 0x1dd   :  { %4480 = vmatprep.mubr.f32.mxu0 %v2167_v41  ;;  %4510 = vmatprep.mubr.f32.mxu1 %v5276_v16 }
 0x1de   :  { %4479 = vmatpush3.msra.mxu0 %v5228_v3  ;;  %4509 = vmatpush3.msra.mxu1 %v5219_v15  ;;  %v139_v3 = vadd.f32 %v5272_v56, %v5207_v61 }
 0x1df   :  { %4496 = vmatprep.subr.mxu0 %v5224_v19  ;;  %4526 = vmatprep.subr.mxu1 %v2839_v36 }
 0x1e0   :  { %4481 = vmatmul.mubr.f32.vlgmr.msra.gmra.mxu0 %v2177_v63  ;;  %4511 = vmatmul.mubr.f32.vlgmr.msra.gmra.mxu1 %v5293_v47  ;;  %v5372_v44 = vand.u32 4294901760, %v139_v3 }
 0x1e1   :  { %4483 = vmatprep.mubr.f32.mxu0 %v2187_v52  ;;  %4513 = vmatprep.mubr.f32.mxu1 %v5295_v58 }
 0x1e2   :  { %v2039_v14 = vpop.trf.xlu0  ;;  %4497 = vmatpush3.msra.mxu0 %v5224_v19  ;;  %4527 = vmatpush3.msra.mxu1 %v2839_v36  ;;  %v5397_v56 = vsub.f32 %v139_v3, %v5372_v44 }
 0x1e3   :  { %v2688_v40 = vsel %vm142_vm0, %v2039_v14, 0  ;;  %4498 = vmatprep.subr.mxu0 %v5243_v37  ;;  %4528 = vmatprep.subr.mxu1 %v2846_v4  ;;  %v3287_v45 = vadd.f32 %v2039_v14, %v5270_v1 }
 0x1e4   :  { %v5347_v15 = vand.u32 4294901760, %v2688_v40  ;;  %4484 = vmatmul.mubr.f32.gmra.mxu0 %v2197_v18  ;;  %4514 = vmatmul.mubr.f32.gmra.mxu1 %v5313_v9  ;;  %v5411_v59 = vand.u32 4294901760, %v5397_v56 }
 0x1e5   :  { %4500 = vmatprep.mubr.f32.mxu0 %v5276_v16  ;;  %4499 = vmatpush3.msra.mxu0 %v5243_v37  ;;  %v3292_v63 = vsel %vm142_vm0, %v3287_v45, 0 }
 0x1e6   :  { %v5355_v19 = vsub.f32 %v2688_v40, %v5347_v15  ;;  %v2040_v39 = vpop.trf.xlu0  ;;  %4530 = vmatprep.mubr.f32.mxu1 %v5347_v15  ;;  %v2071_v27 = vpop.trf.xlu1  ;;  %4516 = vmatprep.subr.mxu0 %v5279_v49  ;;  %v5420_v8 = vand.u32 4294901760, %v3292_v63 }
 0x1e7   :  { %v2691_v33 = vsel %vm142_vm0, %v2040_v39, 0  ;;  %v2694_v42 = vsel %vm142_vm0, %v2071_v27, 0  ;;  %4529 = vmatpush3.msra.mxu1 %v2846_v4  ;;  %v3289_v52 = vadd.f32 %v2071_v27, %v5284_v24  ;;  %v3442_v24 = vsub.f32 %v5397_v56, %v5411_v59 }
 0x1e8   :  { %v5361_v21 = vand.u32 4294901760, %v2691_v33  ;;  %v5363_v37 = vand.u32 4294901760, %v2694_v42  ;;  %4501 = vmatmul.mubr.f32.vlgmr.msra.gmra.mxu0 %v5293_v47  ;;  %v2768_v61 = vand.u32 4294901760, %v5355_v19  ;;  %4546 = vmatprep.subr.mxu1 %v5279_v49  ;;  %v5406_v47 = vsub.f32 %v138_v43, %v5391_v53 }
 0x1e9   :  { %4503 = vmatprep.mubr.f32.mxu0 %v5295_v58  ;;  %4517 = vmatpush3.msra.mxu0 %v5279_v49  ;;  %v3288_v58 = vadd.f32 %v2040_v39, %v5282_v35  ;;  %v3443_v18 = vand.u32 4294901760, %v3442_v24 }
 0x1ea   :  { %v5375_v23 = vsub.f32 %v2691_v33, %v5361_v21  ;;  %v5378_v46 = vsub.f32 %v2694_v42, %v5363_v37  ;;  %4531 = vmatmul.mubr.f32.vlgmr.msra.gmra.mxu1 %v5361_v21  ;;  %v2072_v30 = vpop.trf.xlu1  ;;  %4518 = vmatprep.subr.mxu0 %v5302_v62  ;;  %v2769_v12 = vsub.f32 %v5355_v19, %v2768_v61  ;;  %v5418_v7 = vand.u32 4294901760, %v5406_v47 }
 0x1eb   :  { %v2697_v48 = vsel %vm142_vm0, %v2072_v30, 0  ;;  %4533 = vmatprep.mubr.f32.mxu1 %v5363_v37  ;;  %4519 = vmatpush3.msra.mxu0 %v5302_v62  ;;  %v3290_v0 = vadd.f32 %v2072_v30, %v5307_v5  ;;  %v5438_v5 = vsub.f32 %v3292_v63, %v5420_v8 }
 0x1ec   :  { %v2778_v50 = vand.u32 4294901760, %v5375_v23  ;;  %v5387_v51 = vand.u32 4294901760, %v2697_v48  ;;  %4504 = vmatmul.mubr.f32.gmra.mxu0 %v5313_v9  ;;  %4547 = vmatpush3.msra.mxu1 %v5279_v49  ;;  %v2770_v54 = vand.u32 4294901760, %v2769_v12  ;;  %v2788_v55 = vand.u32 4294901760, %v5378_v46 }
 0x1ed   :  { %4548 = vmatprep.subr.mxu1 %v5302_v62  ;;  %4536 = vmatprep.subr.mxu0 %v5299_v60  ;;  %v3295_v9 = vsel %vm142_vm0, %v3288_v58, 0  ;;  %v3301_v17 = vsel %vm142_vm0, %v3290_v0, 0  ;;  %v3372_v28 = vand.u32 4294901760, %v5438_v5 }
 0x1ee   :  { %v2779_v16 = vsub.f32 %v5375_v23, %v2778_v50  ;;  %v2797_v41 = vsub.f32 %v2697_v48, %v5387_v51  ;;  %4534 = vmatmul.mubr.f32.gmra.mxu1 %v5387_v51  ;;  %4520 = vmatprep.mubr.f32.mxu0 %v2770_v54  ;;  %v2789_v32 = vsub.f32 %v5378_v46, %v2788_v55  ;;  %v5431_v10 = vand.u32 4294901760, %v3295_v9 }
 0x1ef   :  { %4550 = vmatprep.mubr.f32.mxu1 %v2768_v61  ;;  %4549 = vmatpush3.msra.mxu1 %v5302_v62  ;;  %v5449_v25 = vand.u32 4294901760, %v3301_v17 }
 0x1f0   :  { %v2780_v29 = vand.u32 4294901760, %v2779_v16  ;;  %v2798_v57 = vand.u32 4294901760, %v2797_v41  ;;  %v2790_v1 = vand.u32 4294901760, %v2789_v32  ;;  %4566 = vmatprep.subr.mxu1 %v5279_v49  ;;  %v3381_v22 = vsub.f32 %v3295_v9, %v5431_v10 }
 0x1f1   :  { %v3401_v34 = vsub.f32 %v3301_v17, %v5449_v25 }
 0x1f2   :  { %4521 = vmatmul.mubr.f32.vlgmr.msra.gmra.mxu0 %v2780_v29  ;;  %4551 = vmatmul.mubr.f32.vlgmr.msra.gmra.mxu1 %v2778_v50  ;;  %v2799_v6 = vsub.f32 %v2797_v41, %v2798_v57 }
 0x1f3   :  { %4537 = vmatpush3.msra.mxu0 %v5299_v60  ;;  %4523 = vmatprep.mubr.f32.mxu0 %v2790_v1  ;;  %v3298_v60 = vsel %vm142_vm0, %v3289_v52, 0  ;;  %v3402_v36 = vand.u32 4294901760, %v3401_v34 }
 0x1f4   :  { %4553 = vmatprep.mubr.f32.mxu1 %v2788_v55  ;;  %4538 = vmatprep.subr.mxu0 %v5322_v11  ;;  %v2800_v35 = vand.u32 4294901760, %v2799_v6 }
 0x1f5   :  { %4539 = vmatpush3.msra.mxu0 %v5322_v11  ;;  %4567 = vmatpush3.msra.mxu1 %v5279_v49  ;;  %v3449_v49 = vsub.f32 %v5406_v47, %v5418_v7  ;;  %v5440_v11 = vand.u32 4294901760, %v3298_v60  ;;  %v3403_v40 = vsub.f32 %v3401_v34, %v3402_v36 }
 0x1f6   :  { %4524 = vmatmul.mubr.f32.gmra.mxu0 %v2800_v35  ;;  %4554 = vmatmul.mubr.f32.gmra.mxu1 %v2798_v57 }
 0x1f7   :  { %4540 = vmatprep.mubr.f32.mxu0 %v5355_v19  ;;  %4570 = vmatprep.mubr.f32.mxu1 %v5347_v15  ;;  %v3450_v2 = vand.u32 4294901760, %v3449_v49  ;;  %v3404_v3 = vand.u32 4294901760, %v3403_v40 }
 0x1f8   :  { %4568 = vmatprep.subr.mxu1 %v5302_v62  ;;  %4556 = vmatprep.subr.mxu0 %v5318_v13 }
 0x1f9   :  { %4569 = vmatpush3.msra.mxu1 %v5302_v62  ;;  %v3391_v62 = vsub.f32 %v3298_v60, %v5440_v11 }
 0x1fa   :  { %4541 = vmatmul.mubr.f32.vlgmr.msra.gmra.mxu0 %v5375_v23  ;;  %4571 = vmatmul.mubr.f32.vlgmr.msra.gmra.mxu1 %v5361_v21 }
 0x1fb   :  { %4557 = vmatpush3.msra.mxu0 %v5318_v13  ;;  %4543 = vmatprep.mubr.f32.mxu0 %v5378_v46  ;;  %v3382_v13 = vand.u32 4294901760, %v3381_v22  ;;  %v3392_v31 = vand.u32 4294901760, %v3391_v62 }
 0x1fc   :  { %4573 = vmatprep.mubr.f32.mxu1 %v5363_v37  ;;  %4558 = vmatprep.subr.mxu0 %v5330_v26 }
 0x1fd   :  { %4559 = vmatpush3.msra.mxu0 %v5330_v26  ;;  %4586 = vmatprep.subr.mxu1 %v3443_v18  ;;  %v3373_v26 = vsub.f32 %v5438_v5, %v3372_v28  ;;  %v3383_v20 = vsub.f32 %v3381_v22, %v3382_v13  ;;  %v3393_v4 = vsub.f32 %v3391_v62, %v3392_v31 }
 0x1fe   :  { %4544 = vmatmul.mubr.f32.gmra.mxu0 %v2797_v41  ;;  %4574 = vmatmul.mubr.f32.gmra.mxu1 %v5387_v51 }
 0x1ff   :  { %4560 = vmatprep.mubr.f32.mxu0 %v5347_v15  ;;  %4587 = vmatpush3.msra.mxu1 %v3443_v18  ;;  %v3374_v38 = vand.u32 4294901760, %v3373_v26  ;;  %v3384_v14 = vand.u32 4294901760, %v3383_v20  ;;  %v3394_v15 = vand.u32 4294901760, %v3393_v4 }
 0x200   :  { %4590 = vmatprep.mubr.f32.mxu1 %v5420_v8  ;;  %4588 = vmatprep.subr.mxu1 %v3450_v2 }
 0x201   :  { %4576 = vmatprep.subr.mxu0 %v5372_v44  ;;  %4589 = vmatpush3.msra.mxu1 %v3450_v2 }
 0x202   :  { %4561 = vmatmul.mubr.f32.vlgmr.msra.gmra.mxu0 %v5361_v21  ;;  %4591 = vmatmul.mubr.f32.vlgmr.msra.gmra.mxu1 %v5431_v10 }
 0x203   :  { %4577 = vmatpush3.msra.mxu0 %v5372_v44  ;;  %4563 = vmatprep.mubr.f32.mxu0 %v5363_v37 }
 0x204   :  { %4593 = vmatprep.mubr.f32.mxu1 %v5440_v11  ;;  %4578 = vmatprep.subr.mxu0 %v5391_v53 }
 0x205   :  { %4579 = vmatpush3.msra.mxu0 %v5391_v53  ;;  %4606 = vmatprep.subr.mxu1 %v5372_v44 }
 0x206   :  { %4564 = vmatmul.mubr.f32.gmra.mxu0 %v5387_v51  ;;  %4594 = vmatmul.mubr.f32.gmra.mxu1 %v5449_v25 }
 0x207   :  { %4580 = vmatprep.mubr.f32.mxu0 %v3374_v38  ;;  %4607 = vmatpush3.msra.mxu1 %v5372_v44 }
 0x208   :  { %4610 = vmatprep.mubr.f32.mxu1 %v3372_v28  ;;  %4608 = vmatprep.subr.mxu1 %v5391_v53 }
 0x209   :  { %4596 = vmatprep.subr.mxu0 %v5397_v56  ;;  %4609 = vmatpush3.msra.mxu1 %v5391_v53 }
 0x20a   :  { %4581 = vmatmul.mubr.f32.vlgmr.msra.gmra.mxu0 %v3384_v14  ;;  %4611 = vmatmul.mubr.f32.vlgmr.msra.gmra.mxu1 %v3382_v13 }
 0x20b   :  { %4597 = vmatpush3.msra.mxu0 %v5397_v56  ;;  %4583 = vmatprep.mubr.f32.mxu0 %v3394_v15 }
 0x20c   :  { %4613 = vmatprep.mubr.f32.mxu1 %v3392_v31  ;;  %4598 = vmatprep.subr.mxu0 %v5406_v47 }
 0x20d   :  { %4599 = vmatpush3.msra.mxu0 %v5406_v47  ;;  %4626 = vmatprep.subr.mxu1 %v5372_v44 }
 0x20e   :  { %4584 = vmatmul.mubr.f32.gmra.mxu0 %v3404_v3  ;;  %4614 = vmatmul.mubr.f32.gmra.mxu1 %v3402_v36 }
 0x20f   :  { %4600 = vmatprep.mubr.f32.mxu0 %v5438_v5  ;;  %4627 = vmatpush3.msra.mxu1 %v5372_v44 }
 0x210   :  { %4630 = vmatprep.mubr.f32.mxu1 %v5420_v8  ;;  %4628 = vmatprep.subr.mxu1 %v5391_v53 }
 0x211   :  { %4616 = vmatprep.subr.mxu0 %v5411_v59  ;;  %4629 = vmatpush3.msra.mxu1 %v5391_v53 }
 0x212   :  { %4601 = vmatmul.mubr.f32.vlgmr.msra.gmra.mxu0 %v3381_v22  ;;  %4631 = vmatmul.mubr.f32.vlgmr.msra.gmra.mxu1 %v5431_v10 }
 0x213   :  { %4617 = vmatpush3.msra.mxu0 %v5411_v59  ;;  %4603 = vmatprep.mubr.f32.mxu0 %v3391_v62 }
 0x214   :  { %4633 = vmatprep.mubr.f32.mxu1 %v5440_v11  ;;  %4618 = vmatprep.subr.mxu0 %v5418_v7 }
 0x215   :  { %4619 = vmatpush3.msra.mxu0 %v5418_v7 }
 0x216   :  { %4604 = vmatmul.mubr.f32.gmra.mxu0 %v3401_v34  ;;  %4634 = vmatmul.mubr.f32.gmra.mxu1 %v5449_v25 }
 0x217   :  { %4620 = vmatprep.mubr.f32.mxu0 %v5420_v8 }
 0x21a   :  { %4621 = vmatmul.mubr.f32.vlgmr.msra.gmra.mxu0 %v5431_v10 }
 0x21b   :  { %4623 = vmatprep.mubr.f32.mxu0 %v5440_v11 }
 0x21e   :  { %4624 = vmatmul.mubr.f32.gmra.mxu0 %v5449_v25 }
 0x290   :  { %v4472_v19 = vpop.f32.mrf.mxu1 }
 0x292   :  { %v2283_v39 = vpop.f32.mrf.mxu1 }
 0x294   :  { %v4475_v27 = vpop.f32.mrf.mxu1 }
 0x296   :  { %v2295_v33 = vpop.f32.mrf.mxu1 }
 0x298   :  { %v4462_v42 = vpop.f32.mrf.mxu0  ;;  %v4492_v21 = vpop.f32.mrf.mxu1 }
 0x299   :  { %v2290_v11 = vadd.f32 %v4472_v19, %v4462_v42 }
 0x29a   :  { %v2172_v37 = vpop.f32.mrf.mxu0  ;;  %v2473_v61 = vpop.f32.mrf.mxu1 }
 0x29b   :  { %v2284_v8 = vadd.f32 %v2283_v39, %v2172_v37 }
 0x29c   :  { %v4465_v43 = vpop.f32.mrf.mxu0  ;;  %v5496_v44 = vpop.f32.mrf.mxu1 }
 0x29d   :  { %v2302_v36 = vadd.f32 %v4475_v27, %v4465_v43 }
 0x29e   :  { %v2192_v23 = vpop.f32.mrf.mxu0  ;;  %v2489_v46 = vpop.f32.mrf.mxu1 }
 0x29f   :  { %v2296_v22 = vadd.f32 %v2295_v33, %v2192_v23 }
 0x2a0   :  { %v4482_v30 = vpop.f32.mrf.mxu0  ;;  %v5498_v48 = vpop.f32.mrf.mxu1 }
 0x2a1   :  { %v2385_v62 = vadd.f32 %v4482_v30, %v2290_v11 }
 0x2a2   :  { %v2377_v12 = vpop.f32.mrf.mxu0  ;;  %v2665_v50 = vpop.f32.mrf.mxu1 }
 0x2a3   :  { %v2378_v24 = vadd.f32 %v2377_v12, %v2284_v8  ;;  %v2482_v42 = vadd.f32 %v4492_v21, %v2385_v62 }
 0x2a4   :  { %v4485_v51 = vpop.f32.mrf.mxu0  ;;  %v5500_v53 = vpop.f32.mrf.mxu1 }
 0x2a5   :  { %v2474_v28 = vadd.f32 %v2473_v61, %v2378_v24  ;;  %v2399_v39 = vadd.f32 %v4485_v51, %v2302_v36 }
 0x2a6   :  { %v2391_v54 = vpop.f32.mrf.mxu0  ;;  %v5502_v55 = vpop.f32.mrf.mxu1 }
 0x2a7   :  { %v2392_v26 = vadd.f32 %v2391_v54, %v2296_v22 }
 0x2a8   :  { %v4502_v56 = vpop.f32.mrf.mxu0 }
 0x2a9   :  { %v2490_v23 = vadd.f32 %v2489_v46, %v2392_v26  ;;  %v2581_v12 = vadd.f32 %v4502_v56, %v2482_v42 }
 0x2aa   :  { %v2574_v45 = vpop.f32.mrf.mxu0  ;;  %v4532_v16 = vpop.f32.mrf.mxu1 }
 0x2ab   :  { %v2575_v38 = vadd.f32 %v2574_v45, %v2474_v28 }
 0x2ac   :  { %v5504_v41 = vpop.f32.mrf.mxu0  ;;  %v2883_v32 = vpop.f32.mrf.mxu1 }
 0x2ae   :  { %v4535_v29 = vpop.f32.mrf.mxu1  ;;  %v2586_v57 = vpop.f32.mrf.mxu0 }
 0x2af   :  { %v2587_v27 = vadd.f32 %v2586_v57, %v2490_v23 }
 0x2b0   :  { %v2895_v47 = vpop.f32.mrf.mxu1 }
 0x2b2   :  { %v4522_v58 = vpop.f32.mrf.mxu0  ;;  %v4552_v1 = vpop.f32.mrf.mxu1 }
 0x2b3   :  { %v2890_v49 = vadd.f32 %v4532_v16, %v4522_v58  ;;  %v5506_v16 = vadd.f32 %v2665_v50, %v2575_v38 }
 0x2b4   :  { %v2772_v59 = vpop.f32.mrf.mxu0  ;;  %v3073_v63 = vpop.f32.mrf.mxu1 }
 0x2b5   :  { %v2884_v5 = vadd.f32 %v2883_v32, %v2772_v59 }
 0x2b6   :  { %v4525_v52 = vpop.f32.mrf.mxu0  ;;  %v4555_v6 = vpop.f32.mrf.mxu1 }
 0x2b7   :  { %v2902_v31 = vadd.f32 %v4535_v29, %v4525_v52  ;;  %v2678_v52 = vadd.f32 %v5502_v55, %v2587_v27 }
 0x2b8   :  { %v2792_v35 = vpop.f32.mrf.mxu0  ;;  %v3089_v7 = vpop.f32.mrf.mxu1 }
 0x2b9   :  { %v2896_v20 = vadd.f32 %v2895_v47, %v2792_v35  ;;  %v2498_v47 = vadd.f32 %v5496_v44, %v2399_v39 }
 0x2ba   :  { %v4542_v9 = vpop.f32.mrf.mxu0  ;;  %v4572_v0 = vpop.f32.mrf.mxu1 }
 0x2bb   :  { %v2985_v25 = vadd.f32 %v4542_v9, %v2890_v49  ;;  %v2593_v57 = vadd.f32 %v5504_v41, %v2498_v47 }
 0x2bc   :  { %v2977_v60 = vpop.f32.mrf.mxu0  ;;  %v3265_v10 = vpop.f32.mrf.mxu1 }
 0x2bd   :  { %v2978_v2 = vadd.f32 %v2977_v60, %v2884_v5  ;;  %v3082_v3 = vadd.f32 %v4552_v1, %v2985_v25  ;;  %v2684_v60 = vadd.f32 %v5500_v53, %v2593_v57 }
 0x2be   :  { %v4545_v17 = vpop.f32.mrf.mxu0  ;;  %v4575_v18 = vpop.f32.mrf.mxu1 }
 0x2bf   :  { %v2999_v40 = vadd.f32 %v4545_v17, %v2902_v31  ;;  %v3074_v19 = vadd.f32 %v3073_v63, %v2978_v2  ;;  %v2672_v63 = vadd.f32 %v5498_v48, %v2581_v12 }
 0x2c0   :  { %v2991_v13 = vpop.f32.mrf.mxu0  ;;  %v3277_v34 = vpop.f32.mrf.mxu1 }
 0x2c1   :  { %v2992_v15 = vadd.f32 %v2991_v13, %v2896_v20  ;;  %v3098_v45 = vadd.f32 %v4555_v6, %v2999_v40 }
 0x2c2   :  { %v4562_v4 = vpop.f32.mrf.mxu0  ;;  %v4592_v14 = vpop.f32.mrf.mxu1 }
 0x2c3   :  { %v3181_v30 = vadd.f32 %v4562_v4, %v3082_v3  ;;  %v3090_v29 = vadd.f32 %v3089_v7, %v2992_v15 }
 0x2c4   :  { %v3174_v33 = vpop.f32.mrf.mxu0  ;;  %v3487_v37 = vpop.f32.mrf.mxu1 }
 0x2c5   :  { %v3175_v61 = vadd.f32 %v3174_v33, %v3074_v19  ;;  %v5511_v21 = vadd.f32 %v4572_v0, %v3181_v30 }
 0x2c6   :  { %v4565_v54 = vpop.f32.mrf.mxu0  ;;  %v4595_v32 = vpop.f32.mrf.mxu1 }
 0x2c7   :  { %v5508_v43 = vadd.f32 %v3265_v10, %v3175_v61  ;;  %v3193_v1 = vadd.f32 %v4565_v54, %v3098_v45  ;;  %v3892_v8 = vsub.f32 %v2672_v63, %v5511_v21 }
 0x2c8   :  { %v3186_v58 = vpop.f32.mrf.mxu0  ;;  %v3499_v51 = vpop.f32.mrf.mxu1 }
 0x2c9   :  { %v3187_v46 = vadd.f32 %v3186_v58, %v3090_v29  ;;  %v3891_v56 = vsub.f32 %v5506_v16, %v5508_v43  ;;  %v3284_v7 = vadd.f32 %v4575_v18, %v3193_v1 }
 0x2ca   :  { %v4582_v50 = vpop.f32.mrf.mxu0  ;;  %v4612_v59 = vpop.f32.mrf.mxu1 }
 0x2cb   :  { %v3278_v6 = vadd.f32 %v3277_v34, %v3187_v46  ;;  %3903 = vxpose.xlu0.b32.start [1/2] (short) (narrow) %v3891_v56, 16  ;;  %v3894_v48 = vsub.f32 %v2684_v60, %v3284_v7  ;;  %v3494_v5 = vadd.f32 %v4592_v14, %v4582_v50 }
 0x2cc   :  { %v3376_v44 = vpop.f32.mrf.mxu0  ;;  %v3677_v35 = vpop.f32.mrf.mxu1 }
 0x2cd   :  { %v3893_v9 = vsub.f32 %v2678_v52, %v3278_v6  ;;  %v3488_v11 = vadd.f32 %v3487_v37, %v3376_v44 }
 0x2ce   :  { %v4585_v0 = vpop.f32.mrf.mxu0  ;;  %v4615_v24 = vpop.f32.mrf.mxu1 }
 0x2cf   :  { %3904 = vxpose.xlu0.b32.end [2/2] (short) (narrow) %v3892_v8, 16  ;;  %3935 = vxpose.xlu1.b32.start [1/2] (short) (narrow) %v3893_v9, 16  ;;  %v3506_v25 = vadd.f32 %v4595_v32, %v4585_v0 }
 0x2d0   :  { %v3396_v10 = vpop.f32.mrf.mxu0  ;;  %v3693_v49 = vpop.f32.mrf.mxu1 }
 0x2d1   :  { %v3500_v28 = vadd.f32 %v3499_v51, %v3396_v10 }
 0x2d2   :  { %v4602_v41 = vpop.f32.mrf.mxu0  ;;  %v4632_v22 = vpop.f32.mrf.mxu1 }
 0x2d3   :  { %3936 = vxpose.xlu1.b32.end [2/2] (short) (narrow) %v3894_v48, 16  ;;  %v3589_v17 = vadd.f32 %v4602_v41, %v3494_v5 }
 0x2d4   :  { %v3581_v55 = vpop.f32.mrf.mxu0  ;;  %v3869_v53 = vpop.f32.mrf.mxu1 }
 0x2d5   :  { %v3582_v2 = vadd.f32 %v3581_v55, %v3488_v11  ;;  %v3686_v34 = vadd.f32 %v4612_v59, %v3589_v17 }
 0x2d6   :  { %v4605_v18 = vpop.f32.mrf.mxu0  ;;  %v4635_v40 = vpop.f32.mrf.mxu1 }
 0x2d7   :  { %v3603_v13 = vadd.f32 %v4605_v18, %v3506_v25  ;;  %v3678_v36 = vadd.f32 %v3677_v35, %v3582_v2 }
 0x2d8   :  { %v3595_v62 = vpop.f32.mrf.mxu0  ;;  %v3881_v30 = vpop.f32.mrf.mxu1 }
 0x2d9   :  { %v3596_v31 = vadd.f32 %v3595_v62, %v3500_v28  ;;  %v3702_v14 = vadd.f32 %v4615_v24, %v3603_v13 }
 0x2da   :  { %v4622_v26 = vpop.f32.mrf.mxu0 }
 0x2db   :  { %v3785_v20 = vadd.f32 %v4622_v26, %v3686_v34  ;;  %v3694_v42 = vadd.f32 %v3693_v49, %v3596_v31 }
 0x2dc   :  { %v3778_v38 = vpop.f32.mrf.mxu0 }
 0x2dd   :  { %v3779_v4 = vadd.f32 %v3778_v38, %v3678_v36  ;;  %v3876_v3 = vadd.f32 %v4632_v22, %v3785_v20 }
 0x2de   :  { %v4625_v15 = vpop.f32.mrf.mxu0 }
 0x2df   :  { %v3870_v19 = vadd.f32 %v3869_v53, %v3779_v4  ;;  %v3797_v39 = vadd.f32 %v4625_v15, %v3702_v14  ;;  %v3896_v61 = vsub.f32 %v3876_v3, %v2672_v63 }
 0x2e0   :  { %v3790_v33 = vpop.f32.mrf.mxu0 }
 0x2e1   :  { %v3791_v37 = vadd.f32 %v3790_v33, %v3694_v42  ;;  %v3895_v23 = vsub.f32 %v3870_v19, %v5506_v16  ;;  %v3888_v12 = vadd.f32 %v4635_v40, %v3797_v39  ;;  %v3900_v29 = vsub.f32 %v3896_v61, %v5511_v21 }
 0x2e3   :  { %v3882_v54 = vadd.f32 %v3881_v30, %v3791_v37  ;;  %v3899_v32 = vsub.f32 %v3895_v23, %v5508_v43  ;;  %v3898_v45 = vsub.f32 %v3888_v12, %v2684_v60 }
 0x2e5   :  { %3967 = vxpose.xlu0.b32.start [1/2] (short) (narrow) %v3899_v32, 16  ;;  %v3897_v27 = vsub.f32 %v3882_v54, %v2678_v52  ;;  %v3902_v58 = vsub.f32 %v3898_v45, %v3284_v7 }
 0x2e7   :  { %v3901_v47 = vsub.f32 %v3897_v27, %v3278_v6 }
 0x2e9   :  { %3968 = vxpose.xlu0.b32.end [2/2] (short) (narrow) %v3900_v29, 16  ;;  %3999 = vxpose.xlu1.b32.start [1/2] (short) (narrow) %v3901_v47, 16 }
 0x2ed   :  { %4000 = vxpose.xlu1.b32.end [2/2] (short) (narrow) %v3902_v58, 16 }
 0x347   :  { %v3919_v51 = vpop.trf.xlu0 }
 0x348   :  { %4031 = vst.msk [vmem:[#allocation13] sm:$0xff] %vm142_vm0, %v3919_v51 }
 0x34b   :  { %v3951_v16 = vpop.trf.xlu1  ;;  %v3920_v1 = vpop.trf.xlu0 }
 0x34c   :  { %4033 = vst.msk [vmem:[#allocation13 + $0x20] sm:$0xff] %vm142_vm0, %v3951_v16  ;;  %4032 = vst.msk [vmem:[#allocation13 + $0x8] sm:$0xff] %vm142_vm0, %v3920_v1 }
 0x34f   :  { %v3952_v43 = vpop.trf.xlu1 }
 0x350   :  { %4034 = vst.msk [vmem:[#allocation13 + $0x28] sm:$0xff] %vm142_vm0, %v3952_v43 }
 0x361   :  { %v3983_v46 = vpop.trf.xlu0 }
 0x362   :  { %4036 = vst.msk [vmem:[#allocation13 + $0x10] sm:$0xff] %vm142_vm0, %v3983_v46 }
 0x365   :  { %v4015_v21 = vpop.trf.xlu1  ;;  %v3984_v56 = vpop.trf.xlu0 }
 0x366   :  { %4038 = vst.msk [vmem:[#allocation13 + $0x30] sm:$0xff] %vm142_vm0, %v4015_v21  ;;  %4037 = vst.msk [vmem:[#allocation13 + $0x18] sm:$0xff] %vm142_vm0, %v3984_v56 }
 0x369   :  { %v4016_v50 = vpop.trf.xlu1 }
 0x36a   :  { %4039 = vst.msk [vmem:[#allocation13 + $0x38] sm:$0xff] %vm142_vm0, %v4016_v50 }
 0x36b   :  { %4777 = shalt.err (!%p4774_p6)
}
 0x36c   :  { %4051 = dma.vmem_to_hbm [thread:$0]  %s4046_s5, 1024, %s5543_s6, [#allocation4], %s4798_s26, %s4798_s26, %s4799_s27  }
 0x36d   :  { %4794 = dma.done.wait [#allocation4], 1024  }
 0x36e   :  { %4795 = vsyncadd [#allocation4], 4294966272 }
 0x36f   :  { %4055 = vsyncpa [#allocation3], 1 }
 0x370   :  { %4056 = vsyncpa [#allocation6], 1 }
 0x371   :  { %4057 = vsyncpa [#allocation9], 1 }
 0x372   :  { %4058 = vsyncpa [#allocation12], 1 }
 0x373   :  { %4059 = vsyncpa [#allocation4], 1 }

</bundles_post_ra>
